<compile_context>
chip_gen: v7x
topology: tpu7x:2x2x1
jax: 0.10.0
libtpu: 0.0.40
codegen_flags: <defaults>
</compile_context>

<pallas_src>
import functools

import jax
import jax.numpy as jnp
from jax.experimental import pallas as pl
from jax.experimental.pallas import tpu as pltpu

NUM_INPUTS = 784
NUM_HIDDEN = 300
NUM_HIDDEN_PAD = 384   # 3 full lane tiles; padded units stay at mem=0 < threshold
NUM_OUTPUTS = 10
BETA1 = 0.9
BETA2 = 0.8
THRESHOLD = 1.0


def _snn_tile_kernel(x_ref, w1_ref, b1_ref, w2_ref, b2_ref,
                     mem2_rec_ref,
                     cur1_scr, mem1_scr, mem2_scr,
                     *, unroll_lif1, unroll_lif2):
    """One grid step = TT consecutive time steps of one batch tile."""
    t_tile = pl.program_id(1)

    # mem1 = lif1.init_leaky(); mem2 = lif2.init_leaky()  (zeros at sequence
    # start, re-done for every new batch tile since the time index restarts)
    @pl.when(t_tile == 0)
    def _():
        mem1_scr[...] = jnp.zeros_like(mem1_scr)
        mem2_scr[...] = jnp.zeros_like(mem2_scr)

    TT, TB, _ = x_ref.shape  # static block shape

    # ---- fc1 for the whole time tile: one fat MXU matmul -------------------
    # x streamed as bf16 (lossless for 0/1 spikes); compute stays f32 so the
    # result matches the f32 reference exactly.
    x_flat = x_ref[...].reshape(TT * TB, NUM_INPUTS).astype(jnp.float32)
    cur1_scr[...] = (jnp.dot(x_flat, w1_ref[...],
                             preferred_element_type=jnp.float32)
                     + b1_ref[...])

    # ---- LIF1 recurrence: elementwise only; spk1 overwrites cur1 in place --
    def lif1_step(s, mem1):
        off = pl.multiple_of(s * TB, TB)
        cur1 = cur1_scr[pl.ds(off, TB), :]
        reset1 = (mem1 > THRESHOLD).astype(jnp.float32)
        mem1 = BETA1 * mem1 + cur1 - reset1 * THRESHOLD
        spk1 = (mem1 > THRESHOLD).astype(jnp.float32)
        cur1_scr[pl.ds(off, TB), :] = spk1   # reuse cur1 scratch as spk1 buffer
        return mem1

    mem1 = jax.lax.fori_loop(0, TT, lif1_step, mem1_scr[...],
                             unroll=unroll_lif1)
    mem1_scr[...] = mem1   # persist state across time tiles

    # ---- fc2 for the whole tile: one fat matmul, off the serial path -------
    cur2_all = (jnp.dot(cur1_scr[...], w2_ref[...],
                        preferred_element_type=jnp.float32)
                + b2_ref[...])
    mem2_rec_ref[...] = cur2_all.reshape(TT, TB, NUM_OUTPUTS)

    # ---- LIF2 recurrence on tiny (TB, 10) rows, in place in the output -----
    def lif2_step(s, mem2):
        cur2 = mem2_rec_ref[s]
        reset2 = (mem2 > THRESHOLD).astype(jnp.float32)
        mem2 = BETA2 * mem2 + cur2 - reset2 * THRESHOLD
        mem2_rec_ref[s] = mem2
        return mem2

    mem2 = jax.lax.fori_loop(0, TT, lif2_step, mem2_scr[...],
                             unroll=unroll_lif2)
    mem2_scr[...] = mem2
    # spk2 = (mem2 > thr) is recomputed in the JAX wrapper from mem2_rec, so
    # there is no second output stream.


def _round_up(n, m):
    return ((n + m - 1) // m) * m


@functools.partial(jax.jit, static_argnames=("time_tile", "stream_x_bf16"))
def snn_forward(x, w1, b1, w2, b2, *, time_tile=None, stream_x_bf16=True):
    """x: [T, B, NUM_INPUTS] spike-coded. Returns (spk2_rec, mem2_rec): [T, B, 10]."""
    T, B, _ = x.shape

    # ---- batch tiling -------------------------------------------------------
    # bf16 x packs 2 rows per sublane, so split tiles use a 16-row granule
    # (a single full-extent tile is fine at any multiple of 8).
    sub = 16 if stream_x_bf16 else 8
    if B <= 128:
        B_pad = _round_up(B, 8)
        if B_pad >= 2 * sub:
            # >= 2 batch tiles so the "parallel" grid axis can use both
            # TensorCores on v7x (the time axis must stay sequential).
            TB = _round_up((B_pad + 1) // 2, sub)
            B_pad = _round_up(B_pad, TB)
        else:
            TB = B_pad
    else:
        B_pad = _round_up(B, 128)
        TB = 128

    # ---- time tiling: keep the fat fc1 matmul's M = TT*TB >= ~512 rows -----
    # and amortize the ~0.35us/grid-step pipeline overhead. At TT=16, TB=128,
    # bf16 x the VMEM footprint is ~10 MB, well under v7x's 64 MiB.
    if time_tile is None:
        TT = max(16, 512 // TB)
    else:
        TT = time_tile
    TT = min(TT, T)
    T_pad = _round_up(T, TT)

    x_p = jnp.pad(x, ((0, T_pad - T), (0, B_pad - B), (0, 0)))
    if stream_x_bf16:
        # spike-coded inputs are exactly 0/1 -> bf16 storage is lossless and
        # halves the dominant HBM stream and its VMEM double-buffer.
        x_p = x_p.astype(jnp.bfloat16)

    # hidden 300 -> 384: zero-padded w1 cols / b1 / w2 rows => padded units never
    # cross threshold and contribute exactly 0 to fc2; results unchanged.
    hpad = NUM_HIDDEN_PAD - NUM_HIDDEN
    w1_p = jnp.pad(w1, ((0, 0), (0, hpad)))
    b1_p = jnp.pad(b1, ((0, 0), (0, hpad)))
    w2_p = jnp.pad(w2, ((0, hpad), (0, 0)))

    grid = (B_pad // TB, T_pad // TT)

    # Partial unroll at TB=128 keeps LLO scheduling visibility without blowing
    # the 64-vreg file (mem1 alone is 48 vregs); small tiles unroll deeper.
    unroll_lif1 = 8 if TB <= 32 else 2
    unroll_lif2 = 8 if TB <= 32 else 4

    kernel = functools.partial(_snn_tile_kernel,
                               unroll_lif1=unroll_lif1,
                               unroll_lif2=unroll_lif2)

    grid_spec = pltpu.PrefetchScalarGridSpec(
        num_scalar_prefetch=0,
        grid=grid,
        in_specs=[
            # one (TT, TB, 784) input slab per grid step
            pl.BlockSpec((TT, TB, NUM_INPUTS), lambda b, t: (t, b, 0)),
            # weights / biases: constant index_map -> effectively resident
            pl.BlockSpec((NUM_INPUTS, NUM_HIDDEN_PAD), lambda b, t: (0, 0)),
            pl.BlockSpec((1, NUM_HIDDEN_PAD), lambda b, t: (0, 0)),
            pl.BlockSpec((NUM_HIDDEN_PAD, NUM_OUTPUTS), lambda b, t: (0, 0)),
            pl.BlockSpec((1, NUM_OUTPUTS), lambda b, t: (0, 0)),
        ],
        out_specs=pl.BlockSpec((TT, TB, NUM_OUTPUTS), lambda b, t: (t, b, 0)),
        scratch_shapes=[
            pltpu.VMEM((TT * TB, NUM_HIDDEN_PAD), jnp.float32),  # cur1 -> spk1
            pltpu.VMEM((TB, NUM_HIDDEN_PAD), jnp.float32),       # mem1 state
            pltpu.VMEM((TB, NUM_OUTPUTS), jnp.float32),          # mem2 state
        ],
    )

    mem2_rec = pl.pallas_call(
        kernel,
        grid_spec=grid_spec,
        out_shape=jax.ShapeDtypeStruct((T_pad, B_pad, NUM_OUTPUTS), jnp.float32),
        compiler_params=pltpu.CompilerParams(
            # batch tiles are independent -> megacore-parallel on v7x;
            # membrane state carries across the time axis -> must stay sequential.
            dimension_semantics=("parallel", "arbitrary"),
            vmem_limit_bytes=32 * 1024 * 1024,
        ),
    )(x_p, w1_p, b1_p, w2_p, b2)

    mem2_rec = mem2_rec[:T, :B]
    # spk2 is a pure function of the recorded (post-update) mem2.
    spk2_rec = (mem2_rec > THRESHOLD).astype(jnp.float32)
    return spk2_rec, mem2_rec


def init_params(key):
    """Deterministic init mirroring nn.Linear's U(-1/sqrt(fan_in), 1/sqrt(fan_in))."""
    k1, k2, k3, k4 = jax.random.split(key, 4)
    bound1 = 1.0 / jnp.sqrt(NUM_INPUTS)
    bound2 = 1.0 / jnp.sqrt(NUM_HIDDEN)
    w1 = jax.random.uniform(k1, (NUM_INPUTS, NUM_HIDDEN), jnp.float32, -bound1, bound1)
    b1 = jax.random.uniform(k2, (1, NUM_HIDDEN), jnp.float32, -bound1, bound1)
    w2 = jax.random.uniform(k3, (NUM_HIDDEN, NUM_OUTPUTS), jnp.float32, -bound2, bound2)
    b2 = jax.random.uniform(k4, (1, NUM_OUTPUTS), jnp.float32, -bound2, bound2)
    return w1, b1, w2, b2


def reference_forward(x, w1, b1, w2, b2):
    """Pure-JAX reference of the same recurrence (for a sanity check)."""
    B = x.shape[1]
    mem1 = jnp.zeros((B, NUM_HIDDEN), jnp.float32)
    mem2 = jnp.zeros((B, NUM_OUTPUTS), jnp.float32)

    def step(carry, xt):
        mem1, mem2 = carry
        cur1 = xt @ w1 + b1
        r1 = (mem1 > THRESHOLD).astype(jnp.float32)
        mem1 = BETA1 * mem1 + cur1 - r1 * THRESHOLD
        spk1 = (mem1 > THRESHOLD).astype(jnp.float32)
        cur2 = spk1 @ w2 + b2
        r2 = (mem2 > THRESHOLD).astype(jnp.float32)
        mem2 = BETA2 * mem2 + cur2 - r2 * THRESHOLD
        spk2 = (mem2 > THRESHOLD).astype(jnp.float32)
        return (mem1, mem2), (spk2, mem2)

    _, (spk_rec, mem_rec) = jax.lax.scan(step, (mem1, mem2), x)
    return spk_rec, mem_rec


if __name__ == "__main__":
    # Feature dims fixed by the module (784/300/10); short sequence + small batch
    # for the demo (module itself uses num_steps=200).
    T, B = 8, 2

    key = jax.random.PRNGKey(0)
    kx, kp = jax.random.split(key)
    # Rate/spike-coded input: binary spikes in [T, B, 784]
    x = (jax.random.uniform(kx, (T, B, NUM_INPUTS)) < 0.3).astype(jnp.float32)
    w1, b1, w2, b2 = init_params(kp)

    spk2_rec, mem2_rec = snn_forward(x, w1, b1, w2, b2)
    spk2_rec, mem2_rec = jax.block_until_ready((spk2_rec, mem2_rec))

    # correctness check against the pure-JAX reference
    ref_spk, ref_mem = reference_forward(x, w1, b1, w2, b2)
    assert spk2_rec.shape == (T, B, NUM_OUTPUTS)
    assert mem2_rec.shape == (T, B, NUM_OUTPUTS)
    assert jnp.allclose(mem2_rec, ref_mem, atol=1e-4)
    assert jnp.allclose(spk2_rec, ref_spk, atol=1e-5)

    print("KERNEL_OK")
</pallas_src>

<mosaic_0001>
module attributes {stable_mosaic.version = 11 : i64} {
  func.func @_snn_tile_kernel(%arg0: i32, %arg1: i32, %arg2: memref<8x8x784xbf16, #tpu.memory_space<vmem>>, %arg3: memref<784x384xf32, #tpu.memory_space<vmem>>, %arg4: memref<1x384xf32, #tpu.memory_space<vmem>>, %arg5: memref<384x10xf32, #tpu.memory_space<vmem>>, %arg6: memref<1x10xf32, #tpu.memory_space<vmem>>, %arg7: memref<8x8x10xf32, #tpu.memory_space<vmem>>, %arg8: memref<64x384xf32, #tpu.memory_space<vmem>>, %arg9: memref<8x384xf32, #tpu.memory_space<vmem>>, %arg10: memref<8x10xf32, #tpu.memory_space<vmem>>) attributes {dimension_semantics = [#tpu.dimension_semantics<parallel>, #tpu.dimension_semantics<arbitrary>], iteration_bounds = array<i64: 1, 1>, scalar_prefetch = 0 : i64, scratch_operands = 3 : i64, tpu.core_type = #tpu.core_type<tc>, window_params = [{transform_indices = @transform_0, window_bounds = array<i64: 8, 8, 784>}, {pipeline_mode = #tpu.pipeline_mode<synchronous>, transform_indices = @transform_1, window_bounds = array<i64: 784, 384>}, {pipeline_mode = #tpu.pipeline_mode<synchronous>, transform_indices = @transform_2, window_bounds = array<i64: 1, 384>}, {pipeline_mode = #tpu.pipeline_mode<synchronous>, transform_indices = @transform_3, window_bounds = array<i64: 384, 10>}, {pipeline_mode = #tpu.pipeline_mode<synchronous>, transform_indices = @transform_4, window_bounds = array<i64: 1, 10>}, {transform_indices = @transform_5, window_bounds = array<i64: 8, 8, 10>}]} {
    %c0_i32 = arith.constant 0 : i32
    %0 = arith.cmpi eq, %arg1, %c0_i32 : i32
    %1 = arith.extui %0 : i1 to i32
    %c0_i32_0 = arith.constant 0 : i32
    %2 = arith.cmpi ne, %1, %c0_i32_0 : i32
    scf.if %2 {
      %cst_149 = arith.constant 0.000000e+00 : f32
      %320 = vector.broadcast %cst_149 : f32 to vector<8x384xf32>
      %c0_150 = arith.constant 0 : index
      %c0_151 = arith.constant 0 : index
      %321 = vector.load %arg9[%c0_150, %c0_151] : memref<8x384xf32, #tpu.memory_space<vmem>>, vector<8x384xf32>
      tpu.vector_store %arg9[%c0_150, %c0_151], %320 {strides = array<i32>} : memref<8x384xf32, #tpu.memory_space<vmem>>, vector<8x384xf32>,
      %cst_152 = arith.constant 0.000000e+00 : f32
      %322 = vector.broadcast %cst_152 : f32 to vector<8x10xf32>
      %c0_153 = arith.constant 0 : index
      %c0_154 = arith.constant 0 : index
      %323 = vector.load %arg10[%c0_153, %c0_154] : memref<8x10xf32, #tpu.memory_space<vmem>>, vector<8x10xf32>
      tpu.vector_store %arg10[%c0_153, %c0_154], %322 {strides = array<i32>} : memref<8x10xf32, #tpu.memory_space<vmem>>, vector<8x10xf32>,
    } else {
    }
    %c0 = arith.constant 0 : index
    %c0_1 = arith.constant 0 : index
    %c0_2 = arith.constant 0 : index
    %3 = vector.load %arg2[%c0, %c0_1, %c0_2] : memref<8x8x784xbf16, #tpu.memory_space<vmem>>, vector<8x8x784xbf16>
    %4 = vector.shape_cast %3 : vector<8x8x784xbf16> to vector<64x784xbf16>
    %5 = arith.extf %4 : vector<64x784xbf16> to vector<64x784xf32>
    %c0_3 = arith.constant 0 : index
    %c0_4 = arith.constant 0 : index
    %6 = vector.load %arg3[%c0_3, %c0_4] : memref<784x384xf32, #tpu.memory_space<vmem>>, vector<784x384xf32>
    %cst = arith.constant dense<0.000000e+00> : vector<64x384xf32>
    %7 = tpu.matmul %5, %6, %cst {dimension_numbers = #tpu.dot_dimension_numbers<[1], [0], [0], [1], [0, 0, 1, 1], [], []>} : vector<64x784xf32>, vector<784x384xf32>, vector<64x384xf32> -> vector<64x384xf32>
    %c0_5 = arith.constant 0 : index
    %c0_6 = arith.constant 0 : index
    %8 = vector.load %arg4[%c0_5, %c0_6] : memref<1x384xf32, #tpu.memory_space<vmem>>, vector<1x384xf32>
    %9 = vector.broadcast %8 : vector<1x384xf32> to vector<64x384xf32>
    %10 = arith.addf %7, %9 : vector<64x384xf32>
    %c0_7 = arith.constant 0 : index
    %c0_8 = arith.constant 0 : index
    %11 = vector.load %arg8[%c0_7, %c0_8] : memref<64x384xf32, #tpu.memory_space<vmem>>, vector<64x384xf32>
    tpu.vector_store %arg8[%c0_7, %c0_8], %10 {strides = array<i32>} : memref<64x384xf32, #tpu.memory_space<vmem>>, vector<64x384xf32>,
    %c0_9 = arith.constant 0 : index
    %c0_10 = arith.constant 0 : index
    %12 = vector.load %arg9[%c0_9, %c0_10] : memref<8x384xf32, #tpu.memory_space<vmem>>, vector<8x384xf32>
    %c0_i32_11 = arith.constant 0 : i32
    %c8_i32 = arith.constant 8 : i32
    %13 = arith.muli %c0_i32_11, %c8_i32 : i32
    %14 = tpu.assume_multiple %13, 8 : i32
    %15 = arith.index_cast %14 : i32 to index
    %c0_12 = arith.constant 0 : index
    %16 = vector.load %arg8[%15, %c0_12] : memref<64x384xf32, #tpu.memory_space<vmem>>, vector<8x384xf32>
    %cst_13 = arith.constant 1.000000e+00 : f32
    %17 = vector.broadcast %cst_13 : f32 to vector<8x384xf32>
    %18 = arith.cmpf ogt, %12, %17 : vector<8x384xf32>
    %19 = arith.extui %18 : vector<8x384xi1> to vector<8x384xi32>
    %20 = arith.sitofp %19 : vector<8x384xi32> to vector<8x384xf32>
    %cst_14 = arith.constant 0.899999976 : f32
    %21 = vector.broadcast %cst_14 : f32 to vector<8x384xf32>
    %22 = arith.mulf %21, %12 : vector<8x384xf32>
    %23 = arith.addf %22, %16 : vector<8x384xf32>
    %cst_15 = arith.constant 1.000000e+00 : f32
    %24 = vector.broadcast %cst_15 : f32 to vector<8x384xf32>
    %25 = arith.mulf %20, %24 : vector<8x384xf32>
    %26 = arith.subf %23, %25 : vector<8x384xf32>
    %cst_16 = arith.constant 1.000000e+00 : f32
    %27 = vector.broadcast %cst_16 : f32 to vector<8x384xf32>
    %28 = arith.cmpf ogt, %26, %27 : vector<8x384xf32>
    %29 = arith.extui %28 : vector<8x384xi1> to vector<8x384xi32>
    %30 = arith.sitofp %29 : vector<8x384xi32> to vector<8x384xf32>
    %31 = arith.index_cast %14 : i32 to index
    %c0_17 = arith.constant 0 : index
    %32 = vector.load %arg8[%31, %c0_17] : memref<64x384xf32, #tpu.memory_space<vmem>>, vector<8x384xf32>
    tpu.vector_store %arg8[%31, %c0_17], %30 {strides = array<i32>} : memref<64x384xf32, #tpu.memory_space<vmem>>, vector<8x384xf32>,
    %c1_i32 = arith.constant 1 : i32
    %c8_i32_18 = arith.constant 8 : i32
    %33 = arith.muli %c1_i32, %c8_i32_18 : i32
    %34 = tpu.assume_multiple %33, 8 : i32
    %35 = arith.index_cast %34 : i32 to index
    %c0_19 = arith.constant 0 : index
    %36 = vector.load %arg8[%35, %c0_19] : memref<64x384xf32, #tpu.memory_space<vmem>>, vector<8x384xf32>
    %cst_20 = arith.constant 1.000000e+00 : f32
    %37 = vector.broadcast %cst_20 : f32 to vector<8x384xf32>
    %38 = arith.cmpf ogt, %26, %37 : vector<8x384xf32>
    %39 = arith.extui %38 : vector<8x384xi1> to vector<8x384xi32>
    %40 = arith.sitofp %39 : vector<8x384xi32> to vector<8x384xf32>
    %cst_21 = arith.constant 0.899999976 : f32
    %41 = vector.broadcast %cst_21 : f32 to vector<8x384xf32>
    %42 = arith.mulf %41, %26 : vector<8x384xf32>
    %43 = arith.addf %42, %36 : vector<8x384xf32>
    %cst_22 = arith.constant 1.000000e+00 : f32
    %44 = vector.broadcast %cst_22 : f32 to vector<8x384xf32>
    %45 = arith.mulf %40, %44 : vector<8x384xf32>
    %46 = arith.subf %43, %45 : vector<8x384xf32>
    %cst_23 = arith.constant 1.000000e+00 : f32
    %47 = vector.broadcast %cst_23 : f32 to vector<8x384xf32>
    %48 = arith.cmpf ogt, %46, %47 : vector<8x384xf32>
    %49 = arith.extui %48 : vector<8x384xi1> to vector<8x384xi32>
    %50 = arith.sitofp %49 : vector<8x384xi32> to vector<8x384xf32>
    %51 = arith.index_cast %34 : i32 to index
    %c0_24 = arith.constant 0 : index
    %52 = vector.load %arg8[%51, %c0_24] : memref<64x384xf32, #tpu.memory_space<vmem>>, vector<8x384xf32>
    tpu.vector_store %arg8[%51, %c0_24], %50 {strides = array<i32>} : memref<64x384xf32, #tpu.memory_space<vmem>>, vector<8x384xf32>,
    %c2_i32 = arith.constant 2 : i32
    %c8_i32_25 = arith.constant 8 : i32
    %53 = arith.muli %c2_i32, %c8_i32_25 : i32
    %54 = tpu.assume_multiple %53, 8 : i32
    %55 = arith.index_cast %54 : i32 to index
    %c0_26 = arith.constant 0 : index
    %56 = vector.load %arg8[%55, %c0_26] : memref<64x384xf32, #tpu.memory_space<vmem>>, vector<8x384xf32>
    %cst_27 = arith.constant 1.000000e+00 : f32
    %57 = vector.broadcast %cst_27 : f32 to vector<8x384xf32>
    %58 = arith.cmpf ogt, %46, %57 : vector<8x384xf32>
    %59 = arith.extui %58 : vector<8x384xi1> to vector<8x384xi32>
    %60 = arith.sitofp %59 : vector<8x384xi32> to vector<8x384xf32>
    %cst_28 = arith.constant 0.899999976 : f32
    %61 = vector.broadcast %cst_28 : f32 to vector<8x384xf32>
    %62 = arith.mulf %61, %46 : vector<8x384xf32>
    %63 = arith.addf %62, %56 : vector<8x384xf32>
    %cst_29 = arith.constant 1.000000e+00 : f32
    %64 = vector.broadcast %cst_29 : f32 to vector<8x384xf32>
    %65 = arith.mulf %60, %64 : vector<8x384xf32>
    %66 = arith.subf %63, %65 : vector<8x384xf32>
    %cst_30 = arith.constant 1.000000e+00 : f32
    %67 = vector.broadcast %cst_30 : f32 to vector<8x384xf32>
    %68 = arith.cmpf ogt, %66, %67 : vector<8x384xf32>
    %69 = arith.extui %68 : vector<8x384xi1> to vector<8x384xi32>
    %70 = arith.sitofp %69 : vector<8x384xi32> to vector<8x384xf32>
    %71 = arith.index_cast %54 : i32 to index
    %c0_31 = arith.constant 0 : index
    %72 = vector.load %arg8[%71, %c0_31] : memref<64x384xf32, #tpu.memory_space<vmem>>, vector<8x384xf32>
    tpu.vector_store %arg8[%71, %c0_31], %70 {strides = array<i32>} : memref<64x384xf32, #tpu.memory_space<vmem>>, vector<8x384xf32>,
    %c3_i32 = arith.constant 3 : i32
    %c8_i32_32 = arith.constant 8 : i32
    %73 = arith.muli %c3_i32, %c8_i32_32 : i32
    %74 = tpu.assume_multiple %73, 8 : i32
    %75 = arith.index_cast %74 : i32 to index
    %c0_33 = arith.constant 0 : index
    %76 = vector.load %arg8[%75, %c0_33] : memref<64x384xf32, #tpu.memory_space<vmem>>, vector<8x384xf32>
    %cst_34 = arith.constant 1.000000e+00 : f32
    %77 = vector.broadcast %cst_34 : f32 to vector<8x384xf32>
    %78 = arith.cmpf ogt, %66, %77 : vector<8x384xf32>
    %79 = arith.extui %78 : vector<8x384xi1> to vector<8x384xi32>
    %80 = arith.sitofp %79 : vector<8x384xi32> to vector<8x384xf32>
    %cst_35 = arith.constant 0.899999976 : f32
    %81 = vector.broadcast %cst_35 : f32 to vector<8x384xf32>
    %82 = arith.mulf %81, %66 : vector<8x384xf32>
    %83 = arith.addf %82, %76 : vector<8x384xf32>
    %cst_36 = arith.constant 1.000000e+00 : f32
    %84 = vector.broadcast %cst_36 : f32 to vector<8x384xf32>
    %85 = arith.mulf %80, %84 : vector<8x384xf32>
    %86 = arith.subf %83, %85 : vector<8x384xf32>
    %cst_37 = arith.constant 1.000000e+00 : f32
    %87 = vector.broadcast %cst_37 : f32 to vector<8x384xf32>
    %88 = arith.cmpf ogt, %86, %87 : vector<8x384xf32>
    %89 = arith.extui %88 : vector<8x384xi1> to vector<8x384xi32>
    %90 = arith.sitofp %89 : vector<8x384xi32> to vector<8x384xf32>
    %91 = arith.index_cast %74 : i32 to index
    %c0_38 = arith.constant 0 : index
    %92 = vector.load %arg8[%91, %c0_38] : memref<64x384xf32, #tpu.memory_space<vmem>>, vector<8x384xf32>
    tpu.vector_store %arg8[%91, %c0_38], %90 {strides = array<i32>} : memref<64x384xf32, #tpu.memory_space<vmem>>, vector<8x384xf32>,
    %c4_i32 = arith.constant 4 : i32
    %c8_i32_39 = arith.constant 8 : i32
    %93 = arith.muli %c4_i32, %c8_i32_39 : i32
    %94 = tpu.assume_multiple %93, 8 : i32
    %95 = arith.index_cast %94 : i32 to index
    %c0_40 = arith.constant 0 : index
    %96 = vector.load %arg8[%95, %c0_40] : memref<64x384xf32, #tpu.memory_space<vmem>>, vector<8x384xf32>
    %cst_41 = arith.constant 1.000000e+00 : f32
    %97 = vector.broadcast %cst_41 : f32 to vector<8x384xf32>
    %98 = arith.cmpf ogt, %86, %97 : vector<8x384xf32>
    %99 = arith.extui %98 : vector<8x384xi1> to vector<8x384xi32>
    %100 = arith.sitofp %99 : vector<8x384xi32> to vector<8x384xf32>
    %cst_42 = arith.constant 0.899999976 : f32
    %101 = vector.broadcast %cst_42 : f32 to vector<8x384xf32>
    %102 = arith.mulf %101, %86 : vector<8x384xf32>
    %103 = arith.addf %102, %96 : vector<8x384xf32>
    %cst_43 = arith.constant 1.000000e+00 : f32
    %104 = vector.broadcast %cst_43 : f32 to vector<8x384xf32>
    %105 = arith.mulf %100, %104 : vector<8x384xf32>
    %106 = arith.subf %103, %105 : vector<8x384xf32>
    %cst_44 = arith.constant 1.000000e+00 : f32
    %107 = vector.broadcast %cst_44 : f32 to vector<8x384xf32>
    %108 = arith.cmpf ogt, %106, %107 : vector<8x384xf32>
    %109 = arith.extui %108 : vector<8x384xi1> to vector<8x384xi32>
    %110 = arith.sitofp %109 : vector<8x384xi32> to vector<8x384xf32>
    %111 = arith.index_cast %94 : i32 to index
    %c0_45 = arith.constant 0 : index
    %112 = vector.load %arg8[%111, %c0_45] : memref<64x384xf32, #tpu.memory_space<vmem>>, vector<8x384xf32>
    tpu.vector_store %arg8[%111, %c0_45], %110 {strides = array<i32>} : memref<64x384xf32, #tpu.memory_space<vmem>>, vector<8x384xf32>,
    %c5_i32 = arith.constant 5 : i32
    %c8_i32_46 = arith.constant 8 : i32
    %113 = arith.muli %c5_i32, %c8_i32_46 : i32
    %114 = tpu.assume_multiple %113, 8 : i32
    %115 = arith.index_cast %114 : i32 to index
    %c0_47 = arith.constant 0 : index
    %116 = vector.load %arg8[%115, %c0_47] : memref<64x384xf32, #tpu.memory_space<vmem>>, vector<8x384xf32>
    %cst_48 = arith.constant 1.000000e+00 : f32
    %117 = vector.broadcast %cst_48 : f32 to vector<8x384xf32>
    %118 = arith.cmpf ogt, %106, %117 : vector<8x384xf32>
    %119 = arith.extui %118 : vector<8x384xi1> to vector<8x384xi32>
    %120 = arith.sitofp %119 : vector<8x384xi32> to vector<8x384xf32>
    %cst_49 = arith.constant 0.899999976 : f32
    %121 = vector.broadcast %cst_49 : f32 to vector<8x384xf32>
    %122 = arith.mulf %121, %106 : vector<8x384xf32>
    %123 = arith.addf %122, %116 : vector<8x384xf32>
    %cst_50 = arith.constant 1.000000e+00 : f32
    %124 = vector.broadcast %cst_50 : f32 to vector<8x384xf32>
    %125 = arith.mulf %120, %124 : vector<8x384xf32>
    %126 = arith.subf %123, %125 : vector<8x384xf32>
    %cst_51 = arith.constant 1.000000e+00 : f32
    %127 = vector.broadcast %cst_51 : f32 to vector<8x384xf32>
    %128 = arith.cmpf ogt, %126, %127 : vector<8x384xf32>
    %129 = arith.extui %128 : vector<8x384xi1> to vector<8x384xi32>
    %130 = arith.sitofp %129 : vector<8x384xi32> to vector<8x384xf32>
    %131 = arith.index_cast %114 : i32 to index
    %c0_52 = arith.constant 0 : index
    %132 = vector.load %arg8[%131, %c0_52] : memref<64x384xf32, #tpu.memory_space<vmem>>, vector<8x384xf32>
    tpu.vector_store %arg8[%131, %c0_52], %130 {strides = array<i32>} : memref<64x384xf32, #tpu.memory_space<vmem>>, vector<8x384xf32>,
    %c6_i32 = arith.constant 6 : i32
    %c8_i32_53 = arith.constant 8 : i32
    %133 = arith.muli %c6_i32, %c8_i32_53 : i32
    %134 = tpu.assume_multiple %133, 8 : i32
    %135 = arith.index_cast %134 : i32 to index
    %c0_54 = arith.constant 0 : index
    %136 = vector.load %arg8[%135, %c0_54] : memref<64x384xf32, #tpu.memory_space<vmem>>, vector<8x384xf32>
    %cst_55 = arith.constant 1.000000e+00 : f32
    %137 = vector.broadcast %cst_55 : f32 to vector<8x384xf32>
    %138 = arith.cmpf ogt, %126, %137 : vector<8x384xf32>
    %139 = arith.extui %138 : vector<8x384xi1> to vector<8x384xi32>
    %140 = arith.sitofp %139 : vector<8x384xi32> to vector<8x384xf32>
    %cst_56 = arith.constant 0.899999976 : f32
    %141 = vector.broadcast %cst_56 : f32 to vector<8x384xf32>
    %142 = arith.mulf %141, %126 : vector<8x384xf32>
    %143 = arith.addf %142, %136 : vector<8x384xf32>
    %cst_57 = arith.constant 1.000000e+00 : f32
    %144 = vector.broadcast %cst_57 : f32 to vector<8x384xf32>
    %145 = arith.mulf %140, %144 : vector<8x384xf32>
    %146 = arith.subf %143, %145 : vector<8x384xf32>
    %cst_58 = arith.constant 1.000000e+00 : f32
    %147 = vector.broadcast %cst_58 : f32 to vector<8x384xf32>
    %148 = arith.cmpf ogt, %146, %147 : vector<8x384xf32>
    %149 = arith.extui %148 : vector<8x384xi1> to vector<8x384xi32>
    %150 = arith.sitofp %149 : vector<8x384xi32> to vector<8x384xf32>
    %151 = arith.index_cast %134 : i32 to index
    %c0_59 = arith.constant 0 : index
    %152 = vector.load %arg8[%151, %c0_59] : memref<64x384xf32, #tpu.memory_space<vmem>>, vector<8x384xf32>
    tpu.vector_store %arg8[%151, %c0_59], %150 {strides = array<i32>} : memref<64x384xf32, #tpu.memory_space<vmem>>, vector<8x384xf32>,
    %c7_i32 = arith.constant 7 : i32
    %c8_i32_60 = arith.constant 8 : i32
    %153 = arith.muli %c7_i32, %c8_i32_60 : i32
    %154 = tpu.assume_multiple %153, 8 : i32
    %155 = arith.index_cast %154 : i32 to index
    %c0_61 = arith.constant 0 : index
    %156 = vector.load %arg8[%155, %c0_61] : memref<64x384xf32, #tpu.memory_space<vmem>>, vector<8x384xf32>
    %cst_62 = arith.constant 1.000000e+00 : f32
    %157 = vector.broadcast %cst_62 : f32 to vector<8x384xf32>
    %158 = arith.cmpf ogt, %146, %157 : vector<8x384xf32>
    %159 = arith.extui %158 : vector<8x384xi1> to vector<8x384xi32>
    %160 = arith.sitofp %159 : vector<8x384xi32> to vector<8x384xf32>
    %cst_63 = arith.constant 0.899999976 : f32
    %161 = vector.broadcast %cst_63 : f32 to vector<8x384xf32>
    %162 = arith.mulf %161, %146 : vector<8x384xf32>
    %163 = arith.addf %162, %156 : vector<8x384xf32>
    %cst_64 = arith.constant 1.000000e+00 : f32
    %164 = vector.broadcast %cst_64 : f32 to vector<8x384xf32>
    %165 = arith.mulf %160, %164 : vector<8x384xf32>
    %166 = arith.subf %163, %165 : vector<8x384xf32>
    %cst_65 = arith.constant 1.000000e+00 : f32
    %167 = vector.broadcast %cst_65 : f32 to vector<8x384xf32>
    %168 = arith.cmpf ogt, %166, %167 : vector<8x384xf32>
    %169 = arith.extui %168 : vector<8x384xi1> to vector<8x384xi32>
    %170 = arith.sitofp %169 : vector<8x384xi32> to vector<8x384xf32>
    %171 = arith.index_cast %154 : i32 to index
    %c0_66 = arith.constant 0 : index
    %172 = vector.load %arg8[%171, %c0_66] : memref<64x384xf32, #tpu.memory_space<vmem>>, vector<8x384xf32>
    tpu.vector_store %arg8[%171, %c0_66], %170 {strides = array<i32>} : memref<64x384xf32, #tpu.memory_space<vmem>>, vector<8x384xf32>,
    %c8_i32_67 = arith.constant 8 : i32
    %c0_68 = arith.constant 0 : index
    %c0_69 = arith.constant 0 : index
    %173 = vector.load %arg9[%c0_68, %c0_69] : memref<8x384xf32, #tpu.memory_space<vmem>>, vector<8x384xf32>
    tpu.vector_store %arg9[%c0_68, %c0_69], %166 {strides = array<i32>} : memref<8x384xf32, #tpu.memory_space<vmem>>, vector<8x384xf32>,
    %c0_70 = arith.constant 0 : index
    %c0_71 = arith.constant 0 : index
    %174 = vector.load %arg8[%c0_70, %c0_71] : memref<64x384xf32, #tpu.memory_space<vmem>>, vector<64x384xf32>
    %c0_72 = arith.constant 0 : index
    %c0_73 = arith.constant 0 : index
    %175 = vector.load %arg5[%c0_72, %c0_73] : memref<384x10xf32, #tpu.memory_space<vmem>>, vector<384x10xf32>
    %cst_74 = arith.constant dense<0.000000e+00> : vector<64x10xf32>
    %176 = tpu.matmul %174, %175, %cst_74 {dimension_numbers = #tpu.dot_dimension_numbers<[1], [0], [0], [1], [0, 0, 1, 1], [], []>} : vector<64x384xf32>, vector<384x10xf32>, vector<64x10xf32> -> vector<64x10xf32>
    %c0_75 = arith.constant 0 : index
    %c0_76 = arith.constant 0 : index
    %177 = vector.load %arg6[%c0_75, %c0_76] : memref<1x10xf32, #tpu.memory_space<vmem>>, vector<1x10xf32>
    %178 = vector.broadcast %177 : vector<1x10xf32> to vector<64x10xf32>
    %179 = arith.addf %176, %178 : vector<64x10xf32>
    %180 = vector.shape_cast %179 : vector<64x10xf32> to vector<8x8x10xf32>
    %c0_77 = arith.constant 0 : index
    %c0_78 = arith.constant 0 : index
    %c0_79 = arith.constant 0 : index
    %181 = vector.load %arg7[%c0_77, %c0_78, %c0_79] : memref<8x8x10xf32, #tpu.memory_space<vmem>>, vector<8x8x10xf32>
    tpu.vector_store %arg7[%c0_77, %c0_78, %c0_79], %180 {strides = array<i32>} : memref<8x8x10xf32, #tpu.memory_space<vmem>>, vector<8x8x10xf32>,
    %c0_80 = arith.constant 0 : index
    %c0_81 = arith.constant 0 : index
    %182 = vector.load %arg10[%c0_80, %c0_81] : memref<8x10xf32, #tpu.memory_space<vmem>>, vector<8x10xf32>
    %c0_i32_82 = arith.constant 0 : i32
    %183 = arith.index_cast %c0_i32_82 : i32 to index
    %c0_83 = arith.constant 0 : index
    %c0_84 = arith.constant 0 : index
    %184 = vector.load %arg7[%183, %c0_83, %c0_84] : memref<8x8x10xf32, #tpu.memory_space<vmem>>, vector<1x8x10xf32>
    %185 = vector.shape_cast %184 : vector<1x8x10xf32> to vector<8x10xf32>
    %cst_85 = arith.constant 1.000000e+00 : f32
    %186 = vector.broadcast %cst_85 : f32 to vector<8x10xf32>
    %187 = arith.cmpf ogt, %182, %186 : vector<8x10xf32>
    %188 = arith.extui %187 : vector<8x10xi1> to vector<8x10xi32>
    %189 = arith.sitofp %188 : vector<8x10xi32> to vector<8x10xf32>
    %cst_86 = arith.constant 8.000000e-01 : f32
    %190 = vector.broadcast %cst_86 : f32 to vector<8x10xf32>
    %191 = arith.mulf %190, %182 : vector<8x10xf32>
    %192 = arith.addf %191, %185 : vector<8x10xf32>
    %cst_87 = arith.constant 1.000000e+00 : f32
    %193 = vector.broadcast %cst_87 : f32 to vector<8x10xf32>
    %194 = arith.mulf %189, %193 : vector<8x10xf32>
    %195 = arith.subf %192, %194 : vector<8x10xf32>
    %196 = arith.index_cast %c0_i32_82 : i32 to index
    %c0_88 = arith.constant 0 : index
    %c0_89 = arith.constant 0 : index
    %197 = vector.load %arg7[%196, %c0_88, %c0_89] : memref<8x8x10xf32, #tpu.memory_space<vmem>>, vector<1x8x10xf32>
    %198 = vector.shape_cast %197 : vector<1x8x10xf32> to vector<8x10xf32>
    %199 = vector.shape_cast %195 : vector<8x10xf32> to vector<1x8x10xf32>
    tpu.vector_store %arg7[%196, %c0_88, %c0_89], %199 {strides = array<i32>} : memref<8x8x10xf32, #tpu.memory_space<vmem>>, vector<1x8x10xf32>,
    %c1_i32_90 = arith.constant 1 : i32
    %200 = arith.index_cast %c1_i32_90 : i32 to index
    %c0_91 = arith.constant 0 : index
    %c0_92 = arith.constant 0 : index
    %201 = vector.load %arg7[%200, %c0_91, %c0_92] : memref<8x8x10xf32, #tpu.memory_space<vmem>>, vector<1x8x10xf32>
    %202 = vector.shape_cast %201 : vector<1x8x10xf32> to vector<8x10xf32>
    %cst_93 = arith.constant 1.000000e+00 : f32
    %203 = vector.broadcast %cst_93 : f32 to vector<8x10xf32>
    %204 = arith.cmpf ogt, %195, %203 : vector<8x10xf32>
    %205 = arith.extui %204 : vector<8x10xi1> to vector<8x10xi32>
    %206 = arith.sitofp %205 : vector<8x10xi32> to vector<8x10xf32>
    %cst_94 = arith.constant 8.000000e-01 : f32
    %207 = vector.broadcast %cst_94 : f32 to vector<8x10xf32>
    %208 = arith.mulf %207, %195 : vector<8x10xf32>
    %209 = arith.addf %208, %202 : vector<8x10xf32>
    %cst_95 = arith.constant 1.000000e+00 : f32
    %210 = vector.broadcast %cst_95 : f32 to vector<8x10xf32>
    %211 = arith.mulf %206, %210 : vector<8x10xf32>
    %212 = arith.subf %209, %211 : vector<8x10xf32>
    %213 = arith.index_cast %c1_i32_90 : i32 to index
    %c0_96 = arith.constant 0 : index
    %c0_97 = arith.constant 0 : index
    %214 = vector.load %arg7[%213, %c0_96, %c0_97] : memref<8x8x10xf32, #tpu.memory_space<vmem>>, vector<1x8x10xf32>
    %215 = vector.shape_cast %214 : vector<1x8x10xf32> to vector<8x10xf32>
    %216 = vector.shape_cast %212 : vector<8x10xf32> to vector<1x8x10xf32>
    tpu.vector_store %arg7[%213, %c0_96, %c0_97], %216 {strides = array<i32>} : memref<8x8x10xf32, #tpu.memory_space<vmem>>, vector<1x8x10xf32>,
    %c2_i32_98 = arith.constant 2 : i32
    %217 = arith.index_cast %c2_i32_98 : i32 to index
    %c0_99 = arith.constant 0 : index
    %c0_100 = arith.constant 0 : index
    %218 = vector.load %arg7[%217, %c0_99, %c0_100] : memref<8x8x10xf32, #tpu.memory_space<vmem>>, vector<1x8x10xf32>
    %219 = vector.shape_cast %218 : vector<1x8x10xf32> to vector<8x10xf32>
    %cst_101 = arith.constant 1.000000e+00 : f32
    %220 = vector.broadcast %cst_101 : f32 to vector<8x10xf32>
    %221 = arith.cmpf ogt, %212, %220 : vector<8x10xf32>
    %222 = arith.extui %221 : vector<8x10xi1> to vector<8x10xi32>
    %223 = arith.sitofp %222 : vector<8x10xi32> to vector<8x10xf32>
    %cst_102 = arith.constant 8.000000e-01 : f32
    %224 = vector.broadcast %cst_102 : f32 to vector<8x10xf32>
    %225 = arith.mulf %224, %212 : vector<8x10xf32>
    %226 = arith.addf %225, %219 : vector<8x10xf32>
    %cst_103 = arith.constant 1.000000e+00 : f32
    %227 = vector.broadcast %cst_103 : f32 to vector<8x10xf32>
    %228 = arith.mulf %223, %227 : vector<8x10xf32>
    %229 = arith.subf %226, %228 : vector<8x10xf32>
    %230 = arith.index_cast %c2_i32_98 : i32 to index
    %c0_104 = arith.constant 0 : index
    %c0_105 = arith.constant 0 : index
    %231 = vector.load %arg7[%230, %c0_104, %c0_105] : memref<8x8x10xf32, #tpu.memory_space<vmem>>, vector<1x8x10xf32>
    %232 = vector.shape_cast %231 : vector<1x8x10xf32> to vector<8x10xf32>
    %233 = vector.shape_cast %229 : vector<8x10xf32> to vector<1x8x10xf32>
    tpu.vector_store %arg7[%230, %c0_104, %c0_105], %233 {strides = array<i32>} : memref<8x8x10xf32, #tpu.memory_space<vmem>>, vector<1x8x10xf32>,
    %c3_i32_106 = arith.constant 3 : i32
    %234 = arith.index_cast %c3_i32_106 : i32 to index
    %c0_107 = arith.constant 0 : index
    %c0_108 = arith.constant 0 : index
    %235 = vector.load %arg7[%234, %c0_107, %c0_108] : memref<8x8x10xf32, #tpu.memory_space<vmem>>, vector<1x8x10xf32>
    %236 = vector.shape_cast %235 : vector<1x8x10xf32> to vector<8x10xf32>
    %cst_109 = arith.constant 1.000000e+00 : f32
    %237 = vector.broadcast %cst_109 : f32 to vector<8x10xf32>
    %238 = arith.cmpf ogt, %229, %237 : vector<8x10xf32>
    %239 = arith.extui %238 : vector<8x10xi1> to vector<8x10xi32>
    %240 = arith.sitofp %239 : vector<8x10xi32> to vector<8x10xf32>
    %cst_110 = arith.constant 8.000000e-01 : f32
    %241 = vector.broadcast %cst_110 : f32 to vector<8x10xf32>
    %242 = arith.mulf %241, %229 : vector<8x10xf32>
    %243 = arith.addf %242, %236 : vector<8x10xf32>
    %cst_111 = arith.constant 1.000000e+00 : f32
    %244 = vector.broadcast %cst_111 : f32 to vector<8x10xf32>
    %245 = arith.mulf %240, %244 : vector<8x10xf32>
    %246 = arith.subf %243, %245 : vector<8x10xf32>
    %247 = arith.index_cast %c3_i32_106 : i32 to index
    %c0_112 = arith.constant 0 : index
    %c0_113 = arith.constant 0 : index
    %248 = vector.load %arg7[%247, %c0_112, %c0_113] : memref<8x8x10xf32, #tpu.memory_space<vmem>>, vector<1x8x10xf32>
    %249 = vector.shape_cast %248 : vector<1x8x10xf32> to vector<8x10xf32>
    %250 = vector.shape_cast %246 : vector<8x10xf32> to vector<1x8x10xf32>
    tpu.vector_store %arg7[%247, %c0_112, %c0_113], %250 {strides = array<i32>} : memref<8x8x10xf32, #tpu.memory_space<vmem>>, vector<1x8x10xf32>,
    %c4_i32_114 = arith.constant 4 : i32
    %251 = arith.index_cast %c4_i32_114 : i32 to index
    %c0_115 = arith.constant 0 : index
    %c0_116 = arith.constant 0 : index
    %252 = vector.load %arg7[%251, %c0_115, %c0_116] : memref<8x8x10xf32, #tpu.memory_space<vmem>>, vector<1x8x10xf32>
    %253 = vector.shape_cast %252 : vector<1x8x10xf32> to vector<8x10xf32>
    %cst_117 = arith.constant 1.000000e+00 : f32
    %254 = vector.broadcast %cst_117 : f32 to vector<8x10xf32>
    %255 = arith.cmpf ogt, %246, %254 : vector<8x10xf32>
    %256 = arith.extui %255 : vector<8x10xi1> to vector<8x10xi32>
    %257 = arith.sitofp %256 : vector<8x10xi32> to vector<8x10xf32>
    %cst_118 = arith.constant 8.000000e-01 : f32
    %258 = vector.broadcast %cst_118 : f32 to vector<8x10xf32>
    %259 = arith.mulf %258, %246 : vector<8x10xf32>
    %260 = arith.addf %259, %253 : vector<8x10xf32>
    %cst_119 = arith.constant 1.000000e+00 : f32
    %261 = vector.broadcast %cst_119 : f32 to vector<8x10xf32>
    %262 = arith.mulf %257, %261 : vector<8x10xf32>
    %263 = arith.subf %260, %262 : vector<8x10xf32>
    %264 = arith.index_cast %c4_i32_114 : i32 to index
    %c0_120 = arith.constant 0 : index
    %c0_121 = arith.constant 0 : index
    %265 = vector.load %arg7[%264, %c0_120, %c0_121] : memref<8x8x10xf32, #tpu.memory_space<vmem>>, vector<1x8x10xf32>
    %266 = vector.shape_cast %265 : vector<1x8x10xf32> to vector<8x10xf32>
    %267 = vector.shape_cast %263 : vector<8x10xf32> to vector<1x8x10xf32>
    tpu.vector_store %arg7[%264, %c0_120, %c0_121], %267 {strides = array<i32>} : memref<8x8x10xf32, #tpu.memory_space<vmem>>, vector<1x8x10xf32>,
    %c5_i32_122 = arith.constant 5 : i32
    %268 = arith.index_cast %c5_i32_122 : i32 to index
    %c0_123 = arith.constant 0 : index
    %c0_124 = arith.constant 0 : index
    %269 = vector.load %arg7[%268, %c0_123, %c0_124] : memref<8x8x10xf32, #tpu.memory_space<vmem>>, vector<1x8x10xf32>
    %270 = vector.shape_cast %269 : vector<1x8x10xf32> to vector<8x10xf32>
    %cst_125 = arith.constant 1.000000e+00 : f32
    %271 = vector.broadcast %cst_125 : f32 to vector<8x10xf32>
    %272 = arith.cmpf ogt, %263, %271 : vector<8x10xf32>
    %273 = arith.extui %272 : vector<8x10xi1> to vector<8x10xi32>
    %274 = arith.sitofp %273 : vector<8x10xi32> to vector<8x10xf32>
    %cst_126 = arith.constant 8.000000e-01 : f32
    %275 = vector.broadcast %cst_126 : f32 to vector<8x10xf32>
    %276 = arith.mulf %275, %263 : vector<8x10xf32>
    %277 = arith.addf %276, %270 : vector<8x10xf32>
    %cst_127 = arith.constant 1.000000e+00 : f32
    %278 = vector.broadcast %cst_127 : f32 to vector<8x10xf32>
    %279 = arith.mulf %274, %278 : vector<8x10xf32>
    %280 = arith.subf %277, %279 : vector<8x10xf32>
    %281 = arith.index_cast %c5_i32_122 : i32 to index
    %c0_128 = arith.constant 0 : index
    %c0_129 = arith.constant 0 : index
    %282 = vector.load %arg7[%281, %c0_128, %c0_129] : memref<8x8x10xf32, #tpu.memory_space<vmem>>, vector<1x8x10xf32>
    %283 = vector.shape_cast %282 : vector<1x8x10xf32> to vector<8x10xf32>
    %284 = vector.shape_cast %280 : vector<8x10xf32> to vector<1x8x10xf32>
    tpu.vector_store %arg7[%281, %c0_128, %c0_129], %284 {strides = array<i32>} : memref<8x8x10xf32, #tpu.memory_space<vmem>>, vector<1x8x10xf32>,
    %c6_i32_130 = arith.constant 6 : i32
    %285 = arith.index_cast %c6_i32_130 : i32 to index
    %c0_131 = arith.constant 0 : index
    %c0_132 = arith.constant 0 : index
    %286 = vector.load %arg7[%285, %c0_131, %c0_132] : memref<8x8x10xf32, #tpu.memory_space<vmem>>, vector<1x8x10xf32>
    %287 = vector.shape_cast %286 : vector<1x8x10xf32> to vector<8x10xf32>
    %cst_133 = arith.constant 1.000000e+00 : f32
    %288 = vector.broadcast %cst_133 : f32 to vector<8x10xf32>
    %289 = arith.cmpf ogt, %280, %288 : vector<8x10xf32>
    %290 = arith.extui %289 : vector<8x10xi1> to vector<8x10xi32>
    %291 = arith.sitofp %290 : vector<8x10xi32> to vector<8x10xf32>
    %cst_134 = arith.constant 8.000000e-01 : f32
    %292 = vector.broadcast %cst_134 : f32 to vector<8x10xf32>
    %293 = arith.mulf %292, %280 : vector<8x10xf32>
    %294 = arith.addf %293, %287 : vector<8x10xf32>
    %cst_135 = arith.constant 1.000000e+00 : f32
    %295 = vector.broadcast %cst_135 : f32 to vector<8x10xf32>
    %296 = arith.mulf %291, %295 : vector<8x10xf32>
    %297 = arith.subf %294, %296 : vector<8x10xf32>
    %298 = arith.index_cast %c6_i32_130 : i32 to index
    %c0_136 = arith.constant 0 : index
    %c0_137 = arith.constant 0 : index
    %299 = vector.load %arg7[%298, %c0_136, %c0_137] : memref<8x8x10xf32, #tpu.memory_space<vmem>>, vector<1x8x10xf32>
    %300 = vector.shape_cast %299 : vector<1x8x10xf32> to vector<8x10xf32>
    %301 = vector.shape_cast %297 : vector<8x10xf32> to vector<1x8x10xf32>
    tpu.vector_store %arg7[%298, %c0_136, %c0_137], %301 {strides = array<i32>} : memref<8x8x10xf32, #tpu.memory_space<vmem>>, vector<1x8x10xf32>,
    %c7_i32_138 = arith.constant 7 : i32
    %302 = arith.index_cast %c7_i32_138 : i32 to index
    %c0_139 = arith.constant 0 : index
    %c0_140 = arith.constant 0 : index
    %303 = vector.load %arg7[%302, %c0_139, %c0_140] : memref<8x8x10xf32, #tpu.memory_space<vmem>>, vector<1x8x10xf32>
    %304 = vector.shape_cast %303 : vector<1x8x10xf32> to vector<8x10xf32>
    %cst_141 = arith.constant 1.000000e+00 : f32
    %305 = vector.broadcast %cst_141 : f32 to vector<8x10xf32>
    %306 = arith.cmpf ogt, %297, %305 : vector<8x10xf32>
    %307 = arith.extui %306 : vector<8x10xi1> to vector<8x10xi32>
    %308 = arith.sitofp %307 : vector<8x10xi32> to vector<8x10xf32>
    %cst_142 = arith.constant 8.000000e-01 : f32
    %309 = vector.broadcast %cst_142 : f32 to vector<8x10xf32>
    %310 = arith.mulf %309, %297 : vector<8x10xf32>
    %311 = arith.addf %310, %304 : vector<8x10xf32>
    %cst_143 = arith.constant 1.000000e+00 : f32
    %312 = vector.broadcast %cst_143 : f32 to vector<8x10xf32>
    %313 = arith.mulf %308, %312 : vector<8x10xf32>
    %314 = arith.subf %311, %313 : vector<8x10xf32>
    %315 = arith.index_cast %c7_i32_138 : i32 to index
    %c0_144 = arith.constant 0 : index
    %c0_145 = arith.constant 0 : index
    %316 = vector.load %arg7[%315, %c0_144, %c0_145] : memref<8x8x10xf32, #tpu.memory_space<vmem>>, vector<1x8x10xf32>
    %317 = vector.shape_cast %316 : vector<1x8x10xf32> to vector<8x10xf32>
    %318 = vector.shape_cast %314 : vector<8x10xf32> to vector<1x8x10xf32>
    tpu.vector_store %arg7[%315, %c0_144, %c0_145], %318 {strides = array<i32>} : memref<8x8x10xf32, #tpu.memory_space<vmem>>, vector<1x8x10xf32>,
    %c8_i32_146 = arith.constant 8 : i32
    %c0_147 = arith.constant 0 : index
    %c0_148 = arith.constant 0 : index
    %319 = vector.load %arg10[%c0_147, %c0_148] : memref<8x10xf32, #tpu.memory_space<vmem>>, vector<8x10xf32>
    tpu.vector_store %arg10[%c0_147, %c0_148], %314 {strides = array<i32>} : memref<8x10xf32, #tpu.memory_space<vmem>>, vector<8x10xf32>,
    return
  }
  func.func @transform_0(%arg0: i32, %arg1: i32) -> (i32, i32, i32) {
    %c0_i32 = arith.constant 0 : i32
    %c0_i32_0 = arith.constant 0 : i32
    return %arg1, %arg0, %c0_i32 : i32, i32, i32
  }
  func.func @transform_1(%arg0: i32, %arg1: i32) -> (i32, i32) {
    %c0_i32 = arith.constant 0 : i32
    %c0_i32_0 = arith.constant 0 : i32
    %c0_i32_1 = arith.constant 0 : i32
    return %c0_i32, %c0_i32_0 : i32, i32
  }
  func.func @transform_2(%arg0: i32, %arg1: i32) -> (i32, i32) {
    %c0_i32 = arith.constant 0 : i32
    %c0_i32_0 = arith.constant 0 : i32
    %c0_i32_1 = arith.constant 0 : i32
    return %c0_i32, %c0_i32_0 : i32, i32
  }
  func.func @transform_3(%arg0: i32, %arg1: i32) -> (i32, i32) {
    %c0_i32 = arith.constant 0 : i32
    %c0_i32_0 = arith.constant 0 : i32
    %c0_i32_1 = arith.constant 0 : i32
    return %c0_i32, %c0_i32_0 : i32, i32
  }
  func.func @transform_4(%arg0: i32, %arg1: i32) -> (i32, i32) {
    %c0_i32 = arith.constant 0 : i32
    %c0_i32_0 = arith.constant 0 : i32
    %c0_i32_1 = arith.constant 0 : i32
    return %c0_i32, %c0_i32_0 : i32, i32
  }
  func.func @transform_5(%arg0: i32, %arg1: i32) -> (i32, i32, i32) {
    %c0_i32 = arith.constant 0 : i32
    %c0_i32_0 = arith.constant 0 : i32
    return %arg1, %arg0, %c0_i32 : i32, i32, i32
  }
}

</mosaic_0001>

<bundles_post_ra>
// kernel: snn_forward.1
= control target key start
LH: loop header
LB: loop body
LE: loop exit
PB: predicated region body
PF: predicated region fallthrough
CT: control target
= control target key end

     0   :  { %v4612_v3 = vmov 0.0   ;;  %vm428_vm0 = vcmask 130048   ;;  %s4606_s1 = inlined_call_operand.vmem [shape: f32[784,384], index: 1, kind: input, shape index: {}]   ;;  %s4607_s0 = inlined_call_operand.vmem [shape: bf16[8,8,784], index: 0, kind: input, shape index: {}]   ;;  %s4608_s3 = inlined_call_operand.vmem [shape: f32[384,10], index: 3, kind: input, shape index: {}]   ;;  %s4609_s2 = inlined_call_operand.vmem [shape: f32[1,384], index: 2, kind: input, shape index: {}]   ;;  %s4610_s4 = inlined_call_operand.vmem [shape: f32[1,10], index: 4, kind: input, shape index: {}]   ;;  %s4611_s5 = inlined_call_operand.vmem [shape: f32[8,8,10], index: 5, kind: output, shape index: {}]  }
   0x1   :  { %v118_v0 = vld [vmem:[%s4606_s1 + $0x8] sm:$0xff]  ;;  %v121_v1 = vld [vmem:[%s4606_s1 + $0x20] sm:$0xff]  ;;  %856 = vmatprep.mubr.f32.mxu1 %v4612_v3  ;;  %v120_v5 = vld [vmem:[%s4606_s1 + $0x18] sm:$0xff] }
   0x2   :  { %v117_v2 = vld [vmem:[%s4606_s1] sm:$0xff]  ;;  %v2370_v4 = vpack.c.bf16 %v121_v1, %v118_v0  ;;  %v406_v6 = vld [vmem:[%s4606_s1 + $0x908] sm:$0xff]  ;;  %v408_v11 = vld [vmem:[%s4606_s1 + $0x918] sm:$0xff] }
   0x3   :  { %v409_v7 = vld [vmem:[%s4606_s1 + $0x920] sm:$0xff]  ;;  %v2372_v8 = vpack.c.bf16 %v120_v5, %v117_v2  ;;  %v124_v12 = vld [vmem:[%s4606_s1 + $0x38] sm:$0xff]  ;;  %v127_v14 = vld [vmem:[%s4606_s1 + $0x50] sm:$0xff] }
   0x4   :  { %v2562_v9 = vpack.c.bf16 %v409_v7, %v406_v6  ;;  %v405_v10 = vld [vmem:[%s4606_s1 + $0x900] sm:$0xff]  ;;  %2371 = vmatprep.subr.bf16.mxu0 %v2370_v4  ;;  %v123_v15 = vld [vmem:[%s4606_s1 + $0x30] sm:$0xff]  ;;  %v126_v16 = vld [vmem:[%s4606_s1 + $0x48] sm:$0xff]  ;;  %v2374_v17 = vpack.c.bf16 %v127_v14, %v124_v12 }
   0x5   :  { %v2564_v13 = vpack.c.bf16 %v408_v11, %v405_v10  ;;  %2373 = vmatpush1.bf16.msra.mxu0 %v2372_v8  ;;  %v2376_v18 = vpack.c.bf16 %v126_v16, %v123_v15  ;;  %v2868_v19 = vld [vmem:[%s4607_s0 + $0x18] ss:$28 sps:$4 sm:$0xff]   ;;  %v170_v21 = vld [vmem:[%s4606_s1 + $0x1a8] sm:$0xff]  ;;  %v133_v28 = vld [vmem:[%s4606_s1 + $0x80] sm:$0xff] }
   0x6   :  { %2563 = vmatprep.subr.bf16.mxu1 %v2562_v9  ;;  %v167_v20 = vld [vmem:[%s4606_s1 + $0x190] sm:$0xff]  ;;  %v67_v22 = vunpack.c.l.bf16 %v2868_v19  ;;  %v122_v25 = vld [vmem:[%s4606_s1 + $0x28] sm:$0xff]  ;;  %2375 = vmatprep.subr.bf16.mxu0 %v2374_v17  ;;  %v129_v29 = vld [vmem:[%s4606_s1 + $0x60] sm:$0xff]  ;;  %v74_v36 = vunpack.c.h.bf16 %v2868_v19 }
   0x7   :  { %2565 = vmatpush1.bf16.msra.mxu1 %v2564_v13  ;;  %v2566_v23 = vpack.c.bf16 %v170_v21, %v167_v20  ;;  %v119_v24 = vld [vmem:[%s4606_s1 + $0x10] sm:$0xff]  ;;  %v130_v26 = vld [vmem:[%s4606_s1 + $0x68] sm:$0xff]  ;;  %v132_v30 = vld [vmem:[%s4606_s1 + $0x78] sm:$0xff] }
   0x8   :  { %v2568_v27 = vpack.c.bf16 %v122_v25, %v119_v24  ;;  %v2378_v31 = vpack.c.bf16 %v133_v28, %v130_v26  ;;  %v173_v32 = vld [vmem:[%s4606_s1 + $0x1c0] sm:$0xff]  ;;  %v176_v33 = vld [vmem:[%s4606_s1 + $0x1d8] sm:$0xff]  ;;  %v2380_v35 = vpack.c.bf16 %v132_v30, %v129_v29  ;;  %v139_v40 = vld [vmem:[%s4606_s1 + $0xb0] sm:$0xff] }
   0x9   :  { %2567 = vmatprep.subr.bf16.mxu1 %v2566_v23  ;;  %v125_v34 = vld [vmem:[%s4606_s1 + $0x40] sm:$0xff]  ;;  %2377 = vmatpush1.bf16.msra.mxu0 %v2376_v18  ;;  %v2570_v37 = vpack.c.bf16 %v176_v33, %v173_v32  ;;  %v128_v38 = vld [vmem:[%s4606_s1 + $0x58] sm:$0xff]  ;;  %v135_v43 = vld [vmem:[%s4606_s1 + $0x90] sm:$0xff] }
   0xa   :  { %1962 = vmatmul.mubr.msk.f32.vlgmr.msra.gmra.mrb[0].mxu1 %vm428_vm0, %v67_v22  ;;  %v136_v39 = vld [vmem:[%s4606_s1 + $0x98] sm:$0xff]  ;;  %2379 = vmatprep.subr.bf16.mxu0 %v2378_v31  ;;  %v2572_v41 = vpack.c.bf16 %v128_v38, %v125_v34  ;;  %v138_v44 = vld [vmem:[%s4606_s1 + $0xa8] sm:$0xff]  ;;  %v179_v46 = vld [vmem:[%s4606_s1 + $0x1f0] sm:$0xff] }
   0xb   :  { %2569 = vmatpush3.bf16.msra.mxu1 %v2568_v27  ;;  %v2382_v42 = vpack.c.bf16 %v139_v40, %v136_v39  ;;  %v2926_v45 = vld [vmem:[%s4607_s0 + $0x50] ss:$28 sps:$4 sm:$0xff]   ;;  %862 = vmatprep.mubr.f32.mxu1 %v4612_v3  ;;  %v145_v52 = vld [vmem:[%s4606_s1 + $0xe0] sm:$0xff]  ;;  %v2384_v53 = vpack.c.bf16 %v138_v44, %v135_v43  ;;  %v144_v59 = vld [vmem:[%s4606_s1 + $0xd8] sm:$0xff] }
   0xc   :  { %2571 = vmatprep.subr.bf16.mxu1 %v2570_v37  ;;  %v182_v47 = vld [vmem:[%s4606_s1 + $0x208] sm:$0xff]  ;;  %v131_v48 = vld [vmem:[%s4606_s1 + $0x70] sm:$0xff]  ;;  %v81_v54 = vunpack.c.l.bf16 %v2926_v45  ;;  %v141_v55 = vld [vmem:[%s4606_s1 + $0xc0] sm:$0xff]  ;;  %v88_v5 = vunpack.c.h.bf16 %v2926_v45 }
   0xd   :  { %v2574_v49 = vpack.c.bf16 %v182_v47, %v179_v46  ;;  %v134_v50 = vld [vmem:[%s4606_s1 + $0x88] sm:$0xff]  ;;  %2381 = vmatpush1.bf16.msra.mxu0 %v2380_v35  ;;  %v185_v56 = vld [vmem:[%s4606_s1 + $0x220] sm:$0xff]  ;;  %v188_v60 = vld [vmem:[%s4606_s1 + $0x238] sm:$0xff]  ;;  %v2388_v4 = vpack.c.bf16 %v144_v59, %v141_v55 }
   0xe   :  { %v142_v51 = vld [vmem:[%s4606_s1 + $0xc8] sm:$0xff]  ;;  %1963 = vmatmul.mubr.msk.f32.gmra.mrb[2].mxu1 %vm428_vm0, %v74_v36  ;;  %2383 = vmatprep.subr.bf16.mxu0 %v2382_v42  ;;  %v2576_v57 = vpack.c.bf16 %v134_v50, %v131_v48  ;;  %v137_v61 = vld [vmem:[%s4606_s1 + $0xa0] sm:$0xff]  ;;  %v2578_v62 = vpack.c.bf16 %v188_v60, %v185_v56  ;;  %v140_v63 = vld [vmem:[%s4606_s1 + $0xb8] sm:$0xff] }
   0xf   :  { %2573 = vmatpush3.bf16.msra.mxu1 %v2572_v41  ;;  %v2386_v58 = vpack.c.bf16 %v145_v52, %v142_v51  ;;  %868 = vmatprep.mubr.f32.mxu1 %v4612_v3  ;;  %v148_v0 = vld [vmem:[%s4606_s1 + $0xf8] sm:$0xff]  ;;  %v151_v1 = vld [vmem:[%s4606_s1 + $0x110] sm:$0xff]  ;;  %v194_v7 = vld [vmem:[%s4606_s1 + $0x268] sm:$0xff]  ;;  %v2580_v8 = vpack.c.bf16 %v140_v63, %v137_v61 }
  0x10   :  { %2575 = vmatprep.subr.bf16.mxu1 %v2574_v49  ;;  %v191_v2 = vld [vmem:[%s4606_s1 + $0x250] sm:$0xff]  ;;  %v2390_v9 = vpack.c.bf16 %v151_v1, %v148_v0  ;;  %v150_v10 = vld [vmem:[%s4606_s1 + $0x108] sm:$0xff]  ;;  %v157_v16 = vld [vmem:[%s4606_s1 + $0x140] sm:$0xff] }
  0x11   :  { %2385 = vmatpush1.bf16.msra.mxu0 %v2384_v53  ;;  %v147_v6 = vld [vmem:[%s4606_s1 + $0xf0] sm:$0xff]  ;;  %v2995_v11 = vld [vmem:[%s4607_s0 + $0x88] ss:$28 sps:$4 sm:$0xff]   ;;  %v2582_v13 = vpack.c.bf16 %v194_v7, %v191_v2  ;;  %v200_v18 = vld [vmem:[%s4606_s1 + $0x298] sm:$0xff] }
  0x12   :  { %1964 = vmatmul.mubr.msk.f32.gmra.mrb[4].mxu1 %vm428_vm0, %v81_v54  ;;  %2387 = vmatprep.subr.bf16.mxu0 %v2386_v58  ;;  %v143_v12 = vld [vmem:[%s4606_s1 + $0xd0] sm:$0xff]  ;;  %v146_v14 = vld [vmem:[%s4606_s1 + $0xe8] sm:$0xff]  ;;  %v197_v17 = vld [vmem:[%s4606_s1 + $0x280] sm:$0xff]  ;;  %v2392_v20 = vpack.c.bf16 %v150_v10, %v147_v6  ;;  %v95_v21 = vunpack.c.l.bf16 %v2995_v11  ;;  %v102_v35 = vunpack.c.h.bf16 %v2995_v11 }
  0x13   :  { %2577 = vmatpush3.bf16.msra.mxu1 %v2576_v57  ;;  %874 = vmatprep.mubr.f32.mxu1 %v4612_v3  ;;  %v154_v15 = vld [vmem:[%s4606_s1 + $0x128] sm:$0xff]  ;;  %v2584_v23 = vpack.c.bf16 %v146_v14, %v143_v12  ;;  %v153_v25 = vld [vmem:[%s4606_s1 + $0x120] sm:$0xff]  ;;  %v156_v26 = vld [vmem:[%s4606_s1 + $0x138] sm:$0xff]  ;;  %v2586_v28 = vpack.c.bf16 %v200_v18, %v197_v17 }
  0x14   :  { %2579 = vmatprep.subr.bf16.mxu1 %v2578_v62  ;;  %v2394_v24 = vpack.c.bf16 %v157_v16, %v154_v15  ;;  %v149_v27 = vld [vmem:[%s4606_s1 + $0x100] sm:$0xff]  ;;  %v152_v29 = vld [vmem:[%s4606_s1 + $0x118] sm:$0xff]  ;;  %v163_v31 = vld [vmem:[%s4606_s1 + $0x170] sm:$0xff]  ;;  %v2396_v34 = vpack.c.bf16 %v156_v26, %v153_v25 }
  0x15   :  { %2389 = vmatpush1.bf16.msra.mxu0 %v2388_v4  ;;  %v160_v30 = vld [vmem:[%s4606_s1 + $0x158] sm:$0xff]  ;;  %v203_v32 = vld [vmem:[%s4606_s1 + $0x2b0] sm:$0xff]  ;;  %v206_v33 = vld [vmem:[%s4606_s1 + $0x2c8] sm:$0xff]  ;;  %v2588_v39 = vpack.c.bf16 %v152_v29, %v149_v27 }
  0x16   :  { %1965 = vmatmul.mubr.msk.f32.gmra.mrb[6].mxu1 %vm428_vm0, %v88_v5  ;;  %2391 = vmatprep.subr.bf16.mxu0 %v2390_v9  ;;  %v159_v37 = vld [vmem:[%s4606_s1 + $0x150] sm:$0xff]  ;;  %v162_v38 = vld [vmem:[%s4606_s1 + $0x168] sm:$0xff]  ;;  %v2398_v40 = vpack.c.bf16 %v163_v31, %v160_v30  ;;  %v3058_v41 = vld [vmem:[%s4607_s0 + $0xc0] ss:$28 sps:$4 sm:$0xff]   ;;  %v2590_v44 = vpack.c.bf16 %v206_v33, %v203_v32 }
  0x17   :  { %2581 = vmatpush3.bf16.msra.mxu1 %v2580_v8  ;;  %880 = vmatprep.mubr.f32.mxu1 %v4612_v3  ;;  %v155_v42 = vld [vmem:[%s4606_s1 + $0x130] sm:$0xff]  ;;  %v158_v43 = vld [vmem:[%s4606_s1 + $0x148] sm:$0xff]  ;;  %v169_v47 = vld [vmem:[%s4606_s1 + $0x1a0] sm:$0xff]  ;;  %v2400_v51 = vpack.c.bf16 %v162_v38, %v159_v37  ;;  %v109_v52 = vunpack.c.l.bf16 %v3058_v41  ;;  %v116_v4 = vunpack.c.h.bf16 %v3058_v41 }
  0x18   :  { %2583 = vmatprep.subr.bf16.mxu1 %v2582_v13  ;;  %v166_v46 = vld [vmem:[%s4606_s1 + $0x188] sm:$0xff]  ;;  %v3076_v48 = vld [vmem:[%s4607_s0] sm:$0xff]  ;;  %v212_v50 = vld [vmem:[%s4606_s1 + $0x2f8] sm:$0xff]  ;;  %v2592_v53 = vpack.c.bf16 %v158_v43, %v155_v42 }
  0x19   :  { %2393 = vmatpush1.bf16.msra.mxu0 %v2392_v20  ;;  %v209_v49 = vld [vmem:[%s4606_s1 + $0x2e0] sm:$0xff]  ;;  %v2402_v55 = vpack.c.bf16 %v169_v47, %v166_v46  ;;  %v168_v57 = vld [vmem:[%s4606_s1 + $0x198] sm:$0xff]  ;;  %v62_v59 = vunpack.c.h.bf16 %v3076_v48  ;;  %v175_v63 = vld [vmem:[%s4606_s1 + $0x1d0] sm:$0xff] }
  0x1a   :  { %1966 = vmatmul.mubr.msk.f32.gmra.mrb[8].mxu1 %vm428_vm0, %v95_v21  ;;  %2395 = vmatprep.subr.bf16.mxu0 %v2394_v24  ;;  %v165_v56 = vld [vmem:[%s4606_s1 + $0x180] sm:$0xff]  ;;  %v2594_v60 = vpack.c.bf16 %v212_v50, %v209_v49  ;;  %v164_v61 = vld [vmem:[%s4606_s1 + $0x178] sm:$0xff]  ;;  %v263_v0 = vld [vmem:[%s4606_s1 + $0x490] sm:$0xff] }
  0x1b   :  { %2585 = vmatpush3.bf16.msra.mxu1 %v2584_v23  ;;  %886 = vmatprep.mubr.f32.mxu1 %v4612_v3  ;;  %v161_v58 = vld [vmem:[%s4606_s1 + $0x160] sm:$0xff]  ;;  %v172_v62 = vld [vmem:[%s4606_s1 + $0x1b8] sm:$0xff]  ;;  %v266_v1 = vld [vmem:[%s4606_s1 + $0x4a8] sm:$0xff]  ;;  %v2404_v2 = vpack.c.bf16 %v168_v57, %v165_v56  ;;  %v61_v23 = vunpack.c.l.bf16 %v3076_v48 }
  0x1c   :  { %2587 = vmatprep.subr.bf16.mxu1 %v2586_v28  ;;  %517 = vmatprep.mubr.f32.mxu0 %v62_v59  ;;  %v2596_v6 = vpack.c.bf16 %v164_v61, %v161_v58  ;;  %v2406_v7 = vpack.c.bf16 %v175_v63, %v172_v62  ;;  %v171_v8 = vld [vmem:[%s4606_s1 + $0x1b0] sm:$0xff]  ;;  %v174_v9 = vld [vmem:[%s4606_s1 + $0x1c8] sm:$0xff]  ;;  %v2598_v12 = vpack.c.bf16 %v266_v1, %v263_v0  ;;  %v181_v15 = vld [vmem:[%s4606_s1 + $0x200] sm:$0xff] }
  0x1d   :  { %2397 = vmatpush1.bf16.msra.mxu0 %v2396_v34  ;;  %v215_v10 = vld [vmem:[%s4606_s1 + $0x310] sm:$0xff]  ;;  %v218_v13 = vld [vmem:[%s4606_s1 + $0x328] sm:$0xff]  ;;  %v3140_v16 = vld [vmem:[%s4607_s0 + $0x1c] sm:$0xff]  ;;  %v2408_v20 = vpack.c.bf16 %v174_v9, %v171_v8 }
  0x1e   :  { %1967 = vmatmul.mubr.msk.f32.gmra.mrb[10].mxu1 %vm428_vm0, %v102_v35  ;;  %2399 = vmatprep.subr.bf16.mxu0 %v2398_v40  ;;  %v178_v14 = vld [vmem:[%s4606_s1 + $0x1e8] sm:$0xff]  ;;  %v269_v17 = vld [vmem:[%s4606_s1 + $0x4c0] sm:$0xff]  ;;  %v272_v18 = vld [vmem:[%s4606_s1 + $0x4d8] sm:$0xff]  ;;  %v2600_v24 = vpack.c.bf16 %v218_v13, %v215_v10  ;;  %v69_v29 = vunpack.c.h.bf16 %v3140_v16  ;;  %v68_v40 = vunpack.c.l.bf16 %v3140_v16 }
  0x1f   :  { %2589 = vmatpush3.bf16.msra.mxu1 %v2588_v39  ;;  %892 = vmatprep.mubr.f32.mxu1 %v4612_v3  ;;  %v2410_v25 = vpack.c.bf16 %v181_v15, %v178_v14  ;;  %v177_v26 = vld [vmem:[%s4606_s1 + $0x1e0] sm:$0xff]  ;;  %v180_v27 = vld [vmem:[%s4606_s1 + $0x1f8] sm:$0xff]  ;;  %v2602_v30 = vpack.c.bf16 %v272_v18, %v269_v17  ;;  %v187_v33 = vld [vmem:[%s4606_s1 + $0x230] sm:$0xff] }
  0x20   :  { %2591 = vmatprep.subr.bf16.mxu1 %v2590_v44  ;;  %v221_v28 = vld [vmem:[%s4606_s1 + $0x340] sm:$0xff]  ;;  %v224_v31 = vld [vmem:[%s4606_s1 + $0x358] sm:$0xff]  ;;  %v275_v37 = vld [vmem:[%s4606_s1 + $0x4f0] sm:$0xff]  ;;  %v2412_v39 = vpack.c.bf16 %v180_v27, %v177_v26 }
  0x21   :  { %2401 = vmatpush1.bf16.msra.mxu0 %v2400_v51  ;;  %v184_v32 = vld [vmem:[%s4606_s1 + $0x218] sm:$0xff]  ;;  %v278_v38 = vld [vmem:[%s4606_s1 + $0x508] sm:$0xff]  ;;  %v2604_v42 = vpack.c.bf16 %v224_v31, %v221_v28  ;;  %v183_v44 = vld [vmem:[%s4606_s1 + $0x210] sm:$0xff] }
  0x22   :  { %1968 = vmatmul.mubr.msk.f32.gmra.mrb[12].mxu1 %vm428_vm0, %v109_v52  ;;  %2403 = vmatprep.subr.bf16.mxu0 %v2402_v55  ;;  %v3174_v34 = vld [vmem:[%s4607_s0 + $0x38] sm:$0xff]  ;;  %v2414_v43 = vpack.c.bf16 %v187_v33, %v184_v32  ;;  %v186_v46 = vld [vmem:[%s4606_s1 + $0x228] sm:$0xff]  ;;  %v227_v47 = vld [vmem:[%s4606_s1 + $0x370] sm:$0xff]  ;;  %v2606_v50 = vpack.c.bf16 %v278_v38, %v275_v37 }
  0x23   :  { %2593 = vmatpush3.bf16.msra.mxu1 %v2592_v53  ;;  %898 = vmatprep.mubr.f32.mxu1 %v4612_v3  ;;  %v76_v49 = vunpack.c.h.bf16 %v3174_v34  ;;  %v230_v51 = vld [vmem:[%s4606_s1 + $0x388] sm:$0xff]  ;;  %v193_v55 = vld [vmem:[%s4606_s1 + $0x260] sm:$0xff]  ;;  %v3209_v56 = vld [vmem:[%s4607_s0 + $0x54] sm:$0xff] }
  0x24   :  { %2595 = vmatprep.subr.bf16.mxu1 %v2594_v60  ;;  %v190_v53 = vld [vmem:[%s4606_s1 + $0x248] sm:$0xff]  ;;  %v281_v57 = vld [vmem:[%s4606_s1 + $0x520] sm:$0xff]  ;;  %v284_v58 = vld [vmem:[%s4606_s1 + $0x538] sm:$0xff]  ;;  %v75_v60 = vunpack.c.l.bf16 %v3174_v34  ;;  %v2608_v61 = vpack.c.bf16 %v230_v51, %v227_v47  ;;  %v82_v15 = vunpack.c.l.bf16 %v3209_v56 }
  0x25   :  { %2405 = vmatpush1.bf16.msra.mxu0 %v2404_v2  ;;  %v2418_v62 = vpack.c.bf16 %v193_v55, %v190_v53  ;;  %v189_v63 = vld [vmem:[%s4606_s1 + $0x240] sm:$0xff]  ;;  %v192_v0 = vld [vmem:[%s4606_s1 + $0x258] sm:$0xff]  ;;  %v83_v2 = vunpack.c.h.bf16 %v3209_v56  ;;  %v199_v9 = vld [vmem:[%s4606_s1 + $0x290] sm:$0xff] }
  0x26   :  { %1969 = vmatmul.mubr.msk.f32.gmra.mrb[14].mxu1 %vm428_vm0, %v116_v4  ;;  %2407 = vmatprep.subr.bf16.mxu0 %v2406_v7  ;;  %v233_v1 = vld [vmem:[%s4606_s1 + $0x3a0] sm:$0xff]  ;;  %v236_v7 = vld [vmem:[%s4606_s1 + $0x3b8] sm:$0xff]  ;;  %v3244_v10 = vld [vmem:[%s4607_s0 + $0x70] sm:$0xff]  ;;  %v2420_v14 = vpack.c.bf16 %v192_v0, %v189_v63 }
  0x27   :  { %2597 = vmatpush3.bf16.msra.mxu1 %v2596_v6  ;;  %969 = vmatprep.mubr.f32.mxu1 %v62_v59  ;;  %v2416_v59 = vpack.c.bf16 %v186_v46, %v183_v44  ;;  %v2610_v6 = vpack.c.bf16 %v284_v58, %v281_v57  ;;  %v196_v8 = vld [vmem:[%s4606_s1 + $0x278] sm:$0xff]  ;;  %v290_v13 = vld [vmem:[%s4606_s1 + $0x568] sm:$0xff]  ;;  %v2612_v17 = vpack.c.bf16 %v236_v7, %v233_v1  ;;  %v90_v26 = vunpack.c.h.bf16 %v3244_v10  ;;  %v205_v31 = vld [vmem:[%s4606_s1 + $0x2c0] sm:$0xff] }
  0x28   :  { %2599 = vmatprep.subr.bf16.mxu1 %v2598_v12  ;;  %v287_v12 = vld [vmem:[%s4606_s1 + $0x550] sm:$0xff]  ;;  %v2422_v18 = vpack.c.bf16 %v199_v9, %v196_v8  ;;  %v242_v28 = vld [vmem:[%s4606_s1 + $0x3e8] sm:$0xff]  ;;  %v293_v33 = vld [vmem:[%s4606_s1 + $0x580] sm:$0xff] }
  0x29   :  { %2409 = vmatpush1.bf16.msra.mxu0 %v2408_v20  ;;  %v195_v20 = vld [vmem:[%s4606_s1 + $0x270] sm:$0xff]  ;;  %v2614_v27 = vpack.c.bf16 %v290_v13, %v287_v12  ;;  %v296_v37 = vld [vmem:[%s4606_s1 + $0x598] sm:$0xff]  ;;  %v201_v44 = vld [vmem:[%s4606_s1 + $0x2a0] sm:$0xff] }
  0x2a   :  { %970 = vmatmul.mubr.f32.vlgmr.msra.gmra.mrb[16].mxu1 %v61_v23  ;;  %2411 = vmatprep.subr.bf16.mxu0 %v2410_v25  ;;  %v239_v25 = vld [vmem:[%s4606_s1 + $0x3d0] sm:$0xff]  ;;  %v204_v46 = vld [vmem:[%s4606_s1 + $0x2b8] sm:$0xff]  ;;  %v245_v47 = vld [vmem:[%s4606_s1 + $0x400] sm:$0xff]  ;;  %v2618_v51 = vpack.c.bf16 %v296_v37, %v293_v33 }
  0x2b   :  { %2601 = vmatpush3.bf16.msra.mxu1 %v2600_v24  ;;  %974 = vmatprep.mubr.f32.mxu1 %v69_v29  ;;  %v198_v24 = vld [vmem:[%s4606_s1 + $0x288] sm:$0xff]  ;;  %v248_v53 = vld [vmem:[%s4606_s1 + $0x418] sm:$0xff]  ;;  %v211_v57 = vld [vmem:[%s4606_s1 + $0x2f0] sm:$0xff] }
  0x2c   :  { %2603 = vmatprep.subr.bf16.mxu1 %v2602_v30  ;;  %v202_v30 = vld [vmem:[%s4606_s1 + $0x2a8] sm:$0xff]  ;;  %v2424_v38 = vpack.c.bf16 %v198_v24, %v195_v20  ;;  %v208_v55 = vld [vmem:[%s4606_s1 + $0x2d8] sm:$0xff]  ;;  %v2620_v0 = vpack.c.bf16 %v248_v53, %v245_v47  ;;  %v251_v8 = vld [vmem:[%s4606_s1 + $0x430] sm:$0xff] }
  0x2d   :  { %2413 = vmatpush1.bf16.msra.mxu0 %v2412_v39  ;;  %v3279_v32 = vld [vmem:[%s4607_s0 + $0x8c] sm:$0xff]  ;;  %v89_v39 = vunpack.c.l.bf16 %v3244_v10  ;;  %v2430_v1 = vpack.c.bf16 %v211_v57, %v208_v55  ;;  %v305_v20 = vld [vmem:[%s4606_s1 + $0x5e0] sm:$0xff]  ;;  %v308_v24 = vld [vmem:[%s4606_s1 + $0x5f8] sm:$0xff] }
  0x2e   :  { %975 = vmatmul.mubr.f32.gmra.mrb[18].mxu1 %v68_v40  ;;  %2415 = vmatprep.subr.bf16.mxu0 %v2414_v43  ;;  %v2426_v43 = vpack.c.bf16 %v205_v31, %v202_v30  ;;  %v3314_v58 = vld [vmem:[%s4607_s0 + $0xa8] sm:$0xff]  ;;  %v96_v63 = vunpack.c.l.bf16 %v3279_v32  ;;  %v213_v31 = vld [vmem:[%s4606_s1 + $0x300] sm:$0xff]  ;;  %v216_v33 = vld [vmem:[%s4606_s1 + $0x318] sm:$0xff] }
  0x2f   :  { %2605 = vmatpush3.bf16.msra.mxu1 %v2604_v42  ;;  %979 = vmatprep.mubr.f32.mxu1 %v76_v49  ;;  %v2616_v42 = vpack.c.bf16 %v242_v28, %v239_v25  ;;  %v210_v7 = vld [vmem:[%s4606_s1 + $0x2e8] sm:$0xff]  ;;  %v104_v9 = vunpack.c.h.bf16 %v3314_v58  ;;  %v257_v37 = vld [vmem:[%s4606_s1 + $0x460] sm:$0xff]  ;;  %v2436_v55 = vpack.c.bf16 %v216_v33, %v213_v31  ;;  %v240_v16 = vld [vmem:[%s4606_s1 + $0x3d8] sm:$0xff] }
  0x30   :  { %2607 = vmatprep.subr.bf16.mxu1 %v2606_v50  ;;  %v97_v50 = vunpack.c.h.bf16 %v3279_v32  ;;  %v254_v13 = vld [vmem:[%s4606_s1 + $0x448] sm:$0xff]  ;;  %v317_v31 = vld [vmem:[%s4606_s1 + $0x640] sm:$0xff]  ;;  %v252_v34 = vld [vmem:[%s4606_s1 + $0x438] sm:$0xff] }
  0x31   :  { %2417 = vmatpush1.bf16.msra.mxu0 %v2416_v59  ;;  %v299_v59 = vld [vmem:[%s4606_s1 + $0x5b0] sm:$0xff]  ;;  %v2624_v28 = vpack.c.bf16 %v254_v13, %v251_v8  ;;  %v3384_v47 = vld [vmem:[%s4607_s0 + $0x8] sm:$0xff]  ;;  %v229_v13 = vld [vmem:[%s4606_s1 + $0x380] sm:$0xff] }
  0x32   :  { %980 = vmatmul.mubr.f32.gmra.mrb[20].mxu1 %v75_v60  ;;  %2419 = vmatprep.subr.bf16.mxu0 %v2418_v62  ;;  %v2428_v62 = vpack.c.bf16 %v204_v46, %v201_v44  ;;  %v220_v44 = vld [vmem:[%s4606_s1 + $0x338] sm:$0xff]  ;;  %v223_v46 = vld [vmem:[%s4606_s1 + $0x350] sm:$0xff]  ;;  %v362_v53 = vld [vmem:[%s4606_s1 + $0x7a8] sm:$0xff]  ;;  %v63_v48 = vunpack.c.l.bf16 %v3384_v47 }
  0x33   :  { %2609 = vmatpush3.bf16.msra.mxu1 %v2608_v61  ;;  %984 = vmatprep.mubr.f32.mxu1 %v83_v2  ;;  %v302_v61 = vld [vmem:[%s4606_s1 + $0x5c8] sm:$0xff]  ;;  %v261_v3 = vld [vmem:[%s4606_s1 + $0x480] sm:$0xff]  ;;  %v264_v56 = vld [vmem:[%s4606_s1 + $0x498] sm:$0xff] }
  0x34   :  { %2611 = vmatprep.subr.bf16.mxu1 %v2610_v6  ;;  %v207_v6 = vld [vmem:[%s4606_s1 + $0x2d0] sm:$0xff]  ;;  %v2622_v12 = vpack.c.bf16 %v302_v61, %v299_v59  ;;  %v2438_v61 = vpack.c.bf16 %v223_v46, %v220_v44  ;;  %v314_v8 = vld [vmem:[%s4606_s1 + $0x628] sm:$0xff]  ;;  %v3456_v46 = vld [vmem:[%s4607_s0 + $0x40] sm:$0xff] }
  0x35   :  { %2421 = vmatpush1.bf16.msra.mxu0 %v2420_v14  ;;  %v214_v14 = vld [vmem:[%s4606_s1 + $0x308] sm:$0xff]  ;;  %v2432_v25 = vpack.c.bf16 %v210_v7, %v207_v6  ;;  %v64_v6 = vunpack.c.h.bf16 %v3384_v47  ;;  %v235_v44 = vld [vmem:[%s4606_s1 + $0x3b0] sm:$0xff]  ;;  %v276_v10 = vld [vmem:[%s4606_s1 + $0x4f8] sm:$0xff] }
  0x36   :  { %985 = vmatmul.mubr.f32.gmra.mrb[22].mxu1 %v82_v15  ;;  %2423 = vmatprep.subr.bf16.mxu0 %v2422_v18  ;;  %v3349_v18 = vld [vmem:[%s4607_s0 + $0xc4] sm:$0xff]  ;;  %v324_v47 = vld [vmem:[%s4606_s1 + $0x678] sm:$0xff]  ;;  %v355_v41 = vld [vmem:[%s4606_s1 + $0x770] sm:$0xff] }
  0x37   :  { %2613 = vmatpush3.bf16.msra.mxu1 %v2612_v17  ;;  %989 = vmatprep.mubr.f32.mxu1 %v90_v26  ;;  %v217_v17 = vld [vmem:[%s4606_s1 + $0x320] sm:$0xff]  ;;  %v110_v57 = vunpack.c.l.bf16 %v3349_v18  ;;  %v282_v32 = vld [vmem:[%s4606_s1 + $0x528] sm:$0xff]  ;;  %v340_v45 = vld [vmem:[%s4606_s1 + $0x6f8] sm:$0xff] }
  0x38   :  { %2615 = vmatprep.subr.bf16.mxu1 %v2614_v27  ;;  %v103_v27 = vunpack.c.l.bf16 %v3314_v58  ;;  %v2434_v30 = vpack.c.bf16 %v217_v17, %v214_v14  ;;  %v3421_v14 = vld [vmem:[%s4607_s0 + $0x24] sm:$0xff]  ;;  %v288_v58 = vld [vmem:[%s4606_s1 + $0x558] sm:$0xff] }
  0x39   :  { %2425 = vmatpush1.bf16.msra.mxu0 %v2424_v38  ;;  %v111_v38 = vunpack.c.h.bf16 %v3349_v18  ;;  %v365_v17 = vld [vmem:[%s4606_s1 + $0x7c0] sm:$0xff]  ;;  %v71_v33 = vunpack.c.h.bf16 %v3421_v14  ;;  %v294_v18 = vld [vmem:[%s4606_s1 + $0x588] sm:$0xff] }
  0x3a   :  { %990 = vmatmul.mubr.f32.gmra.mrb[24].mxu1 %v89_v39  ;;  %2427 = vmatprep.subr.bf16.mxu0 %v2426_v43  ;;  %v260_v43 = vld [vmem:[%s4606_s1 + $0x478] sm:$0xff]  ;;  %v334_v19 = vld [vmem:[%s4606_s1 + $0x6c8] sm:$0xff] }
  0x3b   :  { %2617 = vmatpush3.bf16.msra.mxu1 %v2616_v42  ;;  %994 = vmatprep.mubr.f32.mxu1 %v97_v50  ;;  %v2626_v42 = vpack.c.bf16 %v308_v24, %v305_v20  ;;  %v2628_v59 = vpack.c.bf16 %v260_v43, %v257_v37  ;;  %v368_v20 = vld [vmem:[%s4606_s1 + $0x7d8] sm:$0xff]  ;;  %v346_v11 = vld [vmem:[%s4606_s1 + $0x728] sm:$0xff] }
  0x3c   :  { %2619 = vmatprep.subr.bf16.mxu1 %v2618_v51  ;;  %v359_v51 = vld [vmem:[%s4606_s1 + $0x790] sm:$0xff]  ;;  %v2634_v37 = vpack.c.bf16 %v368_v20, %v365_v17  ;;  %v232_v43 = vld [vmem:[%s4606_s1 + $0x398] sm:$0xff]  ;;  %v241_v17 = vld [vmem:[%s4606_s1 + $0x3e0] sm:$0xff] }
  0x3d   :  { %2429 = vmatpush1.bf16.msra.mxu0 %v2428_v62  ;;  %v219_v62 = vld [vmem:[%s4606_s1 + $0x330] sm:$0xff]  ;;  %v2630_v7 = vpack.c.bf16 %v362_v53, %v359_v51  ;;  %v374_v53 = vld [vmem:[%s4606_s1 + $0x808] sm:$0xff]  ;;  %v3493_v20 = vld [vmem:[%s4607_s0 + $0x5c] sm:$0xff] }
  0x3e   :  { %995 = vmatmul.mubr.f32.gmra.mrb[26].mxu1 %v96_v63  ;;  %2431 = vmatprep.subr.bf16.mxu0 %v2430_v1  ;;  %v311_v1 = vld [vmem:[%s4606_s1 + $0x610] sm:$0xff] }
  0x3f   :  { %2621 = vmatpush3.bf16.msra.mxu1 %v2620_v0  ;;  %999 = vmatprep.mubr.f32.mxu1 %v104_v9  ;;  %v222_v0 = vld [vmem:[%s4606_s1 + $0x348] sm:$0xff]  ;;  %v371_v51 = vld [vmem:[%s4606_s1 + $0x7f0] sm:$0xff] }
  0x40   :  { %2623 = vmatprep.subr.bf16.mxu1 %v2622_v12  ;;  %v226_v12 = vld [vmem:[%s4606_s1 + $0x368] sm:$0xff]  ;;  %v2440_v24 = vpack.c.bf16 %v222_v0, %v219_v62  ;;  %v2446_v62 = vpack.c.bf16 %v235_v44, %v232_v43  ;;  %v231_v0 = vld [vmem:[%s4606_s1 + $0x390] sm:$0xff]  ;;  %v332_v44 = vld [vmem:[%s4606_s1 + $0x6b8] sm:$0xff] }
  0x41   :  { %2433 = vmatpush1.bf16.msra.mxu0 %v2432_v25  ;;  %v2442_v25 = vpack.c.bf16 %v229_v13, %v226_v12  ;;  %v326_v12 = vld [vmem:[%s4606_s1 + $0x688] sm:$0xff] }
  0x42   :  { %1000 = vmatmul.mubr.f32.gmra.mrb[28].mxu1 %v103_v27  ;;  %2435 = vmatprep.subr.bf16.mxu0 %v2434_v30  ;;  %v228_v30 = vld [vmem:[%s4606_s1 + $0x378] sm:$0xff]  ;;  %v238_v13 = vld [vmem:[%s4606_s1 + $0x3c8] sm:$0xff] }
  0x43   :  { %2625 = vmatpush3.bf16.msra.mxu1 %v2624_v28  ;;  %1004 = vmatprep.mubr.f32.mxu1 %v111_v38  ;;  %v225_v28 = vld [vmem:[%s4606_s1 + $0x360] sm:$0xff] }
  0x44   :  { %2627 = vmatprep.subr.bf16.mxu1 %v2626_v42  ;;  %518 = vmatmul.mubr.f32.vlgmr.msra.gmra.mrb[0].mxu0 %v61_v23  ;;  %v2632_v23 = vpack.c.bf16 %v314_v8, %v311_v1  ;;  %v320_v42 = vld [vmem:[%s4606_s1 + $0x658] sm:$0xff]  ;;  %v234_v1 = vld [vmem:[%s4606_s1 + $0x3a8] sm:$0xff]  ;;  %v2638_v8 = vpack.c.bf16 %v374_v53, %v371_v51  ;;  %v247_v53 = vld [vmem:[%s4606_s1 + $0x410] sm:$0xff] }
  0x45   :  { %2437 = vmatpush1.bf16.msra.mxu0 %v2436_v55  ;;  %523 = vmatprep.mubr.f32.mxu0 %v69_v29  ;;  %v2444_v55 = vpack.c.bf16 %v228_v30, %v225_v28  ;;  %v323_v29 = vld [vmem:[%s4606_s1 + $0x670] sm:$0xff]  ;;  %v77_v28 = vunpack.c.l.bf16 %v3456_v46  ;;  %v244_v51 = vld [vmem:[%s4606_s1 + $0x3f8] sm:$0xff] }
  0x46   :  { %1005 = vmatmul.mubr.f32.gmra.mrb[30].mxu1 %v110_v57  ;;  %2439 = vmatprep.subr.bf16.mxu0 %v2438_v61  ;;  %v2636_v61 = vpack.c.bf16 %v320_v42, %v317_v31  ;;  %v2640_v30 = vpack.c.bf16 %v326_v12, %v323_v29  ;;  %v2450_v31 = vpack.c.bf16 %v241_v17, %v238_v13  ;;  %v85_v42 = vunpack.c.h.bf16 %v3493_v20  ;;  %v243_v12 = vld [vmem:[%s4606_s1 + $0x3f0] sm:$0xff]  ;;  %v246_v13 = vld [vmem:[%s4606_s1 + $0x408] sm:$0xff] }
  0x47   :  { %2629 = vmatpush3.bf16.msra.mxu1 %v2628_v59  ;;  %1074 = vmatprep.mubr.f32.mxu1 %v64_v6  ;;  %v70_v59 = vunpack.c.l.bf16 %v3421_v14 }
  0x48   :  { %2631 = vmatprep.subr.bf16.mxu1 %v2630_v7  ;;  %v78_v7 = vunpack.c.h.bf16 %v3456_v46  ;;  %524 = vmatmul.mubr.f32.gmra.mrb[2].mxu0 %v68_v40  ;;  %v329_v40 = vld [vmem:[%s4606_s1 + $0x6a0] sm:$0xff] }
  0x49   :  { %2441 = vmatpush1.bf16.msra.mxu0 %v2440_v24  ;;  %v377_v24 = vld [vmem:[%s4606_s1 + $0x820] sm:$0xff]  ;;  %529 = vmatprep.mubr.f32.mxu0 %v76_v49  ;;  %v2644_v29 = vpack.c.bf16 %v332_v44, %v329_v40  ;;  %v335_v49 = vld [vmem:[%s4606_s1 + $0x6d0] sm:$0xff]  ;;  %v2456_v40 = vpack.c.bf16 %v246_v13, %v243_v12 }
  0x4a   :  { %1075 = vmatmul.mubr.f32.vlgmr.msra.gmra.mrb[32].mxu1 %v63_v48  ;;  %2443 = vmatprep.subr.bf16.mxu0 %v2442_v25  ;;  %v2448_v25 = vpack.c.bf16 %v234_v1, %v231_v0  ;;  %v84_v1 = vunpack.c.l.bf16 %v3493_v20  ;;  %v3604_v12 = vld [vmem:[%s4607_s0 + $0xb0] sm:$0xff] }
  0x4b   :  { %2633 = vmatpush3.bf16.msra.mxu1 %v2632_v23  ;;  %1079 = vmatprep.mubr.f32.mxu1 %v71_v33  ;;  %v380_v23 = vld [vmem:[%s4606_s1 + $0x838] sm:$0xff]  ;;  %v395_v13 = vld [vmem:[%s4606_s1 + $0x8b0] sm:$0xff] }
  0x4c   :  { %2635 = vmatprep.subr.bf16.mxu1 %v2634_v37  ;;  %v237_v37 = vld [vmem:[%s4606_s1 + $0x3c0] sm:$0xff]  ;;  %v2642_v43 = vpack.c.bf16 %v380_v23, %v377_v24  ;;  %v338_v23 = vld [vmem:[%s4606_s1 + $0x6e8] sm:$0xff]  ;;  %530 = vmatmul.mubr.f32.gmra.mrb[4].mxu0 %v75_v60 }
  0x4d   :  { %2445 = vmatpush1.bf16.msra.mxu0 %v2444_v55  ;;  %v3530_v55 = vld [vmem:[%s4607_s0 + $0x78] sm:$0xff]  ;;  %v2452_v0 = vpack.c.bf16 %v240_v16, %v237_v37  ;;  %v389_v37 = vld [vmem:[%s4606_s1 + $0x880] sm:$0xff]  ;;  %v2648_v44 = vpack.c.bf16 %v338_v23, %v335_v49  ;;  %v398_v49 = vld [vmem:[%s4606_s1 + $0x8c8] sm:$0xff]  ;;  %535 = vmatprep.mubr.f32.mxu0 %v83_v2 }
  0x4e   :  { %1080 = vmatmul.mubr.f32.gmra.mrb[34].mxu1 %v70_v59  ;;  %2447 = vmatprep.subr.bf16.mxu0 %v2446_v62  ;;  %v386_v62 = vld [vmem:[%s4606_s1 + $0x868] sm:$0xff]  ;;  %v92_v17 = vunpack.c.h.bf16 %v3530_v55  ;;  %v392_v16 = vld [vmem:[%s4606_s1 + $0x898] sm:$0xff]  ;;  %v341_v60 = vld [vmem:[%s4606_s1 + $0x700] sm:$0xff] }
  0x4f   :  { %2637 = vmatpush3.bf16.msra.mxu1 %v2636_v61  ;;  %1084 = vmatprep.mubr.f32.mxu1 %v78_v7  ;;  %v383_v61 = vld [vmem:[%s4606_s1 + $0x850] sm:$0xff] }
  0x50   :  { %2639 = vmatprep.subr.bf16.mxu1 %v2638_v8  ;;  %v2454_v8 = vpack.c.bf16 %v247_v53, %v244_v51  ;;  %v2646_v24 = vpack.c.bf16 %v386_v62, %v383_v61  ;;  %v249_v53 = vld [vmem:[%s4606_s1 + $0x420] sm:$0xff]  ;;  %v2650_v62 = vpack.c.bf16 %v392_v16, %v389_v37  ;;  %v255_v37 = vld [vmem:[%s4606_s1 + $0x450] sm:$0xff]  ;;  %v258_v16 = vld [vmem:[%s4606_s1 + $0x468] sm:$0xff]  ;;  %536 = vmatmul.mubr.f32.gmra.mrb[6].mxu0 %v82_v15 }
  0x51   :  { %2449 = vmatpush1.bf16.msra.mxu0 %v2448_v25  ;;  %v250_v25 = vld [vmem:[%s4606_s1 + $0x428] sm:$0xff]  ;;  %v347_v2 = vld [vmem:[%s4606_s1 + $0x730] sm:$0xff]  ;;  %v353_v15 = vld [vmem:[%s4606_s1 + $0x760] sm:$0xff]  ;;  %541 = vmatprep.mubr.f32.mxu0 %v90_v26 }
  0x52   :  { %1085 = vmatmul.mubr.f32.gmra.mrb[36].mxu1 %v77_v28  ;;  %2451 = vmatprep.subr.bf16.mxu0 %v2450_v31  ;;  %v3567_v31 = vld [vmem:[%s4607_s0 + $0x94] sm:$0xff] }
  0x53   :  { %2641 = vmatpush3.bf16.msra.mxu1 %v2640_v30  ;;  %1089 = vmatprep.mubr.f32.mxu1 %v85_v42  ;;  %v253_v30 = vld [vmem:[%s4606_s1 + $0x440] sm:$0xff]  ;;  %v99_v61 = vunpack.c.h.bf16 %v3567_v31  ;;  %v98_v23 = vunpack.c.l.bf16 %v3567_v31  ;;  %v267_v26 = vld [vmem:[%s4606_s1 + $0x4b0] sm:$0xff]  ;;  %v358_v31 = vld [vmem:[%s4606_s1 + $0x788] sm:$0xff] }
  0x54   :  { %2643 = vmatprep.subr.bf16.mxu1 %v2642_v43  ;;  %v91_v43 = vunpack.c.l.bf16 %v3530_v55  ;;  %v2458_v51 = vpack.c.bf16 %v253_v30, %v250_v25  ;;  %542 = vmatmul.mubr.f32.gmra.mrb[8].mxu0 %v89_v39  ;;  %v352_v55 = vld [vmem:[%s4606_s1 + $0x758] sm:$0xff] }
  0x55   :  { %2453 = vmatpush1.bf16.msra.mxu0 %v2452_v0  ;;  %v344_v0 = vld [vmem:[%s4606_s1 + $0x718] sm:$0xff]  ;;  %547 = vmatprep.mubr.f32.mxu0 %v97_v50  ;;  %v279_v50 = vld [vmem:[%s4606_s1 + $0x510] sm:$0xff] }
  0x56   :  { %1090 = vmatmul.mubr.f32.gmra.mrb[38].mxu1 %v84_v1  ;;  %2455 = vmatprep.subr.bf16.mxu0 %v2454_v8  ;;  %v259_v8 = vld [vmem:[%s4606_s1 + $0x470] sm:$0xff]  ;;  %v2652_v25 = vpack.c.bf16 %v344_v0, %v341_v60  ;;  %v404_v0 = vld [vmem:[%s4606_s1 + $0x8f8] sm:$0xff] }
  0x57   :  { %2645 = vmatpush3.bf16.msra.mxu1 %v2644_v29  ;;  %1094 = vmatprep.mubr.f32.mxu1 %v92_v17  ;;  %v256_v29 = vld [vmem:[%s4606_s1 + $0x458] sm:$0xff]  ;;  %v3641_v60 = vld [vmem:[%s4607_s0 + $0xcc] sm:$0xff] }
  0x58   :  { %2647 = vmatprep.subr.bf16.mxu1 %v2646_v24  ;;  %v2460_v24 = vpack.c.bf16 %v252_v34, %v249_v53  ;;  %v2462_v30 = vpack.c.bf16 %v259_v8, %v256_v29  ;;  %v262_v53 = vld [vmem:[%s4606_s1 + $0x488] sm:$0xff]  ;;  %v265_v34 = vld [vmem:[%s4606_s1 + $0x4a0] sm:$0xff]  ;;  %v2464_v29 = vpack.c.bf16 %v258_v16, %v255_v37  ;;  %v105_v8 = vunpack.c.l.bf16 %v3604_v12  ;;  %v268_v37 = vld [vmem:[%s4606_s1 + $0x4b8] sm:$0xff]  ;;  %548 = vmatmul.mubr.f32.gmra.mrb[10].mxu0 %v96_v63 }
  0x59   :  { %2457 = vmatpush1.bf16.msra.mxu0 %v2456_v40  ;;  %v106_v40 = vunpack.c.h.bf16 %v3604_v12  ;;  %v271_v16 = vld [vmem:[%s4606_s1 + $0x4d0] sm:$0xff]  ;;  %553 = vmatprep.mubr.f32.mxu0 %v104_v9  ;;  %v285_v9 = vld [vmem:[%s4606_s1 + $0x540] sm:$0xff]  ;;  %v364_v12 = vld [vmem:[%s4606_s1 + $0x7b8] sm:$0xff] }
  0x5a   :  { %1095 = vmatmul.mubr.f32.gmra.mrb[40].mxu1 %v91_v43  ;;  %2459 = vmatprep.subr.bf16.mxu0 %v2458_v51  ;;  %v350_v51 = vld [vmem:[%s4606_s1 + $0x748] sm:$0xff] }
  0x5b   :  { %2649 = vmatpush3.bf16.msra.mxu1 %v2648_v44  ;;  %1099 = vmatprep.mubr.f32.mxu1 %v99_v61  ;;  %v2654_v44 = vpack.c.bf16 %v398_v49, %v395_v13  ;;  %v2656_v13 = vpack.c.bf16 %v350_v51, %v347_v2  ;;  %v2466_v49 = vpack.c.bf16 %v265_v34, %v262_v53  ;;  %v3678_v2 = vld [vmem:[%s4607_s0 + $0x10] sm:$0xff]  ;;  %v112_v51 = vunpack.c.l.bf16 %v3641_v60  ;;  %v410_v34 = vld [vmem:[%s4606_s1 + $0x928] sm:$0xff] }
  0x5c   :  { %2651 = vmatprep.subr.bf16.mxu1 %v2650_v62  ;;  %v401_v62 = vld [vmem:[%s4606_s1 + $0x8e0] sm:$0xff]  ;;  %v407_v53 = vld [vmem:[%s4606_s1 + $0x910] sm:$0xff]  ;;  %554 = vmatmul.mubr.f32.gmra.mrb[12].mxu0 %v103_v27 }
  0x5d   :  { %2461 = vmatpush1.bf16.msra.mxu0 %v2460_v24  ;;  %v113_v24 = vunpack.c.h.bf16 %v3641_v60  ;;  %559 = vmatprep.mubr.f32.mxu0 %v111_v38  ;;  %v370_v60 = vld [vmem:[%s4606_s1 + $0x7e8] sm:$0xff] }
  0x5e   :  { %1100 = vmatmul.mubr.f32.gmra.mrb[42].mxu1 %v98_v23  ;;  %2463 = vmatprep.subr.bf16.mxu0 %v2462_v30  ;;  %v356_v30 = vld [vmem:[%s4606_s1 + $0x778] sm:$0xff] }
  0x5f   :  { %2653 = vmatpush3.bf16.msra.mxu1 %v2652_v25  ;;  %1104 = vmatprep.mubr.f32.mxu1 %v106_v40  ;;  %v2658_v25 = vpack.c.bf16 %v404_v0, %v401_v62  ;;  %v2660_v62 = vpack.c.bf16 %v356_v30, %v353_v15  ;;  %v2470_v0 = vpack.c.bf16 %v271_v16, %v268_v37  ;;  %v65_v30 = vunpack.c.l.bf16 %v3678_v2  ;;  %v273_v16 = vld [vmem:[%s4606_s1 + $0x4e0] sm:$0xff] }
  0x60   :  { %2655 = vmatprep.subr.bf16.mxu1 %v2654_v44  ;;  %v2468_v44 = vpack.c.bf16 %v264_v56, %v261_v3  ;;  %v270_v3 = vld [vmem:[%s4606_s1 + $0x4c8] sm:$0xff]  ;;  %v2662_v15 = vpack.c.bf16 %v410_v34, %v407_v53  ;;  %v283_v53 = vld [vmem:[%s4606_s1 + $0x530] sm:$0xff]  ;;  %560 = vmatmul.mubr.f32.gmra.mrb[14].mxu0 %v110_v57 }
  0x61   :  { %2465 = vmatpush1.bf16.msra.mxu0 %v2464_v29  ;;  %v66_v29 = vunpack.c.h.bf16 %v3678_v2  ;;  %v3709_v56 = vld [vmem:[%s4607_s0 + $0x2c] sm:$0xff]  ;;  %630 = vmatprep.mubr.f32.mxu0 %v64_v6  ;;  %v300_v6 = vld [vmem:[%s4606_s1 + $0x5b8] sm:$0xff] }
  0x62   :  { %1105 = vmatmul.mubr.f32.gmra.mrb[44].mxu1 %v105_v8  ;;  %2467 = vmatprep.subr.bf16.mxu0 %v2466_v49  ;;  %v277_v49 = vld [vmem:[%s4606_s1 + $0x500] sm:$0xff]  ;;  %v73_v39 = vunpack.c.h.bf16 %v3709_v56  ;;  %v3734_v34 = vld [vmem:[%s4607_s0 + $0x48] sm:$0xff] }
  0x63   :  { %2657 = vmatpush3.bf16.msra.mxu1 %v2656_v13  ;;  %1109 = vmatprep.mubr.f32.mxu1 %v113_v24  ;;  %v274_v13 = vld [vmem:[%s4606_s1 + $0x4e8] sm:$0xff]  ;;  %v80_v63 = vunpack.c.h.bf16 %v3734_v34 }
  0x64   :  { %2659 = vmatprep.subr.bf16.mxu1 %v2658_v25  ;;  %v2472_v25 = vpack.c.bf16 %v270_v3, %v267_v26  ;;  %v2474_v37 = vpack.c.bf16 %v277_v49, %v274_v13  ;;  %v286_v3 = vld [vmem:[%s4606_s1 + $0x548] sm:$0xff]  ;;  %v289_v13 = vld [vmem:[%s4606_s1 + $0x560] sm:$0xff] }
  0x65   :  { %2469 = vmatpush1.bf16.msra.mxu0 %v2468_v44  ;;  %v280_v44 = vld [vmem:[%s4606_s1 + $0x518] sm:$0xff]  ;;  %v3761_v49 = vld [vmem:[%s4607_s0 + $0x64] sm:$0xff] }
  0x66   :  { %1110 = vmatmul.mubr.f32.gmra.mrb[46].mxu1 %v112_v51  ;;  %2471 = vmatprep.subr.bf16.mxu0 %v2470_v0  ;;  %v72_v0 = vunpack.c.l.bf16 %v3709_v56  ;;  %v2478_v26 = vpack.c.bf16 %v283_v53, %v280_v44  ;;  %v87_v27 = vunpack.c.h.bf16 %v3761_v49  ;;  %v3788_v44 = vld [vmem:[%s4607_s0 + $0x80] sm:$0xff]  ;;  %v2484_v53 = vpack.c.bf16 %v288_v58, %v285_v9  ;;  %v298_v57 = vld [vmem:[%s4606_s1 + $0x5a8] sm:$0xff] }
  0x67   :  { %2661 = vmatpush3.bf16.msra.mxu1 %v2660_v62  ;;  %1179 = vmatprep.mubr.f32.mxu1 %v66_v29  ;;  %v2476_v62 = vpack.c.bf16 %v276_v10, %v273_v16  ;;  %v2482_v16 = vpack.c.bf16 %v289_v13, %v286_v3  ;;  %v295_v10 = vld [vmem:[%s4606_s1 + $0x590] sm:$0xff]  ;;  %v4616_v38 = vunpack.c.h.bf16 %v3788_v44  ;;  %v3815_v3 = vld [vmem:[%s4607_s0 + $0x9c] sm:$0xff]  ;;  %v4619_v2 = vunpack.c.h.bf16 %v3788_v44 }
  0x68   :  { %2663 = vmatprep.subr.bf16.mxu1 %v2662_v15  ;;  %v297_v9 = vld [vmem:[%s4606_s1 + $0x5a0] sm:$0xff]  ;;  %v4614_v58 = vunpack.c.h.bf16 %v3815_v3  ;;  %v4621_v56 = vunpack.c.h.bf16 %v3815_v3 }
  0x69   :  { %2473 = vmatpush1.bf16.msra.mxu0 %v2472_v25  ;;  %v2480_v25 = vpack.c.bf16 %v282_v32, %v279_v50  ;;  %v291_v50 = vld [vmem:[%s4606_s1 + $0x570] sm:$0xff]  ;;  %v301_v32 = vld [vmem:[%s4606_s1 + $0x5c0] sm:$0xff] }
  0x6a   :  { %1180 = vmatmul.mubr.f32.vlgmr.msra.gmra.mrb[48].mxu1 %v65_v30  ;;  %2475 = vmatprep.subr.bf16.mxu0 %v2474_v37  ;;  %v79_v37 = vunpack.c.l.bf16 %v3734_v34  ;;  %v2488_v13 = vpack.c.bf16 %v294_v18, %v291_v50  ;;  %v4618_v50 = vunpack.c.l.bf16 %v3815_v3 }
  0x6b   :  { %1184 = vmatprep.mubr.f32.mxu1 %v73_v39  ;;  %2665 = vmatpush3.bf16.msra.mxu1 %v2662_v15  ;;  %v292_v15 = vld [vmem:[%s4606_s1 + $0x578] sm:$0xff] }
  0x6d   :  { %2477 = vmatpush1.bf16.msra.mxu0 %v2476_v62  ;;  %v86_v62 = vunpack.c.l.bf16 %v3761_v49 }
  0x6e   :  { %1185 = vmatmul.mubr.f32.gmra.mrb[50].mxu1 %v72_v0  ;;  %2479 = vmatprep.subr.bf16.mxu0 %v2478_v26  ;;  %v2486_v26 = vpack.c.bf16 %v295_v10, %v292_v15  ;;  %v304_v15 = vld [vmem:[%s4606_s1 + $0x5d8] sm:$0xff]  ;;  %v307_v10 = vld [vmem:[%s4606_s1 + $0x5f0] sm:$0xff] }
  0x6f   :  { %1189 = vmatprep.mubr.f32.mxu1 %v80_v63  ;;  %v2494_v18 = vpack.c.bf16 %v307_v10, %v304_v15 }
  0x71   :  { %2481 = vmatpush1.bf16.msra.mxu0 %v2480_v25  ;;  %v4615_v25 = vunpack.c.l.bf16 %v3788_v44 }
  0x72   :  { %1190 = vmatmul.mubr.f32.gmra.mrb[52].mxu1 %v79_v37  ;;  %2483 = vmatprep.subr.bf16.mxu0 %v2482_v16  ;;  %v2490_v16 = vpack.c.bf16 %v301_v32, %v298_v57  ;;  %v303_v57 = vld [vmem:[%s4606_s1 + $0x5d0] sm:$0xff]  ;;  %v306_v32 = vld [vmem:[%s4606_s1 + $0x5e8] sm:$0xff] }
  0x73   :  { %1194 = vmatprep.mubr.f32.mxu1 %v87_v27  ;;  %v2496_v15 = vpack.c.bf16 %v306_v32, %v303_v57  ;;  %v316_v57 = vld [vmem:[%s4606_s1 + $0x638] sm:$0xff] }
  0x75   :  { %2485 = vmatpush1.bf16.msra.mxu0 %v2484_v53  ;;  %v3840_v53 = vld [vmem:[%s4607_s0 + $0xb8] sm:$0xff] }
  0x76   :  { %1195 = vmatmul.mubr.f32.gmra.mrb[54].mxu1 %v86_v62  ;;  %2487 = vmatprep.subr.bf16.mxu0 %v2486_v26  ;;  %v2492_v26 = vpack.c.bf16 %v300_v6, %v297_v9  ;;  %v310_v9 = vld [vmem:[%s4606_s1 + $0x608] sm:$0xff]  ;;  %v3863_v6 = vld [vmem:[%s4607_s0 + $0xd4] sm:$0xff]  ;;  %v107_v10 = vunpack.c.l.bf16 %v3840_v53  ;;  %v4623_v34 = vunpack.c.h.bf16 %v3840_v53 }
  0x77   :  { %1199 = vmatprep.mubr.f32.mxu1 %v4616_v38  ;;  %v312_v38 = vld [vmem:[%s4606_s1 + $0x618] sm:$0xff] }
  0x79   :  { %2489 = vmatpush1.bf16.msra.mxu0 %v2488_v13  ;;  %v4617_v13 = vunpack.c.h.bf16 %v3840_v53 }
  0x7a   :  { %1200 = vmatmul.mubr.f32.gmra.mrb[56].mxu1 %v4615_v25  ;;  %2491 = vmatprep.subr.bf16.mxu0 %v2490_v16  ;;  %v313_v16 = vld [vmem:[%s4606_s1 + $0x620] sm:$0xff] }
  0x7b   :  { %1204 = vmatprep.mubr.f32.mxu1 %v4614_v58  ;;  %v2498_v58 = vpack.c.bf16 %v313_v16, %v310_v9  ;;  %v309_v25 = vld [vmem:[%s4606_s1 + $0x600] sm:$0xff]  ;;  %v114_v9 = vunpack.c.l.bf16 %v3863_v6 }
  0x7c   :  { %v2500_v32 = vpack.c.bf16 %v312_v38, %v309_v25  ;;  %v325_v38 = vld [vmem:[%s4606_s1 + $0x680] sm:$0xff] }
  0x7d   :  { %2493 = vmatpush1.bf16.msra.mxu0 %v2492_v26  ;;  %v115_v26 = vunpack.c.h.bf16 %v3863_v6 }
  0x7e   :  { %1205 = vmatmul.mubr.f32.gmra.mrb[58].mxu1 %v4618_v50  ;;  %2495 = vmatprep.subr.bf16.mxu0 %v2494_v18  ;;  %v319_v18 = vld [vmem:[%s4606_s1 + $0x650] sm:$0xff]  ;;  %v318_v50 = vld [vmem:[%s4606_s1 + $0x648] sm:$0xff] }
  0x7f   :  { %1209 = vmatprep.mubr.f32.mxu1 %v4617_v13  ;;  %v2502_v16 = vpack.c.bf16 %v319_v18, %v316_v57  ;;  %v315_v13 = vld [vmem:[%s4606_s1 + $0x630] sm:$0xff]  ;;  %v321_v57 = vld [vmem:[%s4606_s1 + $0x660] sm:$0xff] }
  0x80   :  { %v2504_v25 = vpack.c.bf16 %v318_v50, %v315_v13  ;;  %v331_v50 = vld [vmem:[%s4606_s1 + $0x6b0] sm:$0xff] }
  0x81   :  { %2497 = vmatpush1.bf16.msra.mxu0 %v2496_v15  ;;  %v322_v15 = vld [vmem:[%s4606_s1 + $0x668] sm:$0xff]  ;;  %v327_v18 = vld [vmem:[%s4606_s1 + $0x690] sm:$0xff] }
  0x82   :  { %1210 = vmatmul.mubr.f32.gmra.mrb[60].mxu1 %v107_v10  ;;  %2499 = vmatprep.subr.bf16.mxu0 %v2498_v58  ;;  %v2506_v58 = vpack.c.bf16 %v325_v38, %v322_v15  ;;  %v357_v15 = vld [vmem:[%s4606_s1 + $0x780] sm:$0xff]  ;;  %v360_v38 = vld [vmem:[%s4606_s1 + $0x798] sm:$0xff] }
  0x83   :  { %1214 = vmatprep.mubr.f32.mxu1 %v115_v26 }
  0x84   :  { %631 = vmatmul.mubr.f32.vlgmr.msra.gmra.mrb[0].mxu0 %v63_v48  ;;  %v328_v48 = vld [vmem:[%s4606_s1 + $0x698] sm:$0xff] }
  0x85   :  { %2501 = vmatpush1.bf16.msra.mxu0 %v2500_v32  ;;  %636 = vmatprep.mubr.f32.mxu0 %v71_v33  ;;  %v2510_v13 = vpack.c.bf16 %v331_v50, %v328_v48  ;;  %v330_v32 = vld [vmem:[%s4606_s1 + $0x6a8] sm:$0xff]  ;;  %v333_v33 = vld [vmem:[%s4606_s1 + $0x6c0] sm:$0xff]  ;;  %v372_v50 = vld [vmem:[%s4606_s1 + $0x7f8] sm:$0xff] }
  0x86   :  { %1215 = vmatmul.mubr.f32.gmra.mrb[62].mxu1 %v114_v9  ;;  %2503 = vmatprep.subr.bf16.mxu0 %v2502_v16  ;;  %v2512_v14 = vpack.c.bf16 %v330_v32, %v327_v18  ;;  %v369_v48 = vld [vmem:[%s4606_s1 + $0x7e0] sm:$0xff] }
  0x87   :  { %2314 = vmatprep.mubr.msk.f32.mxu1 %vm428_vm0, %v67_v22  ;;  %v2508_v22 = vpack.c.bf16 %v324_v47, %v321_v57  ;;  %v366_v57 = vld [vmem:[%s4606_s1 + $0x7c8] sm:$0xff]  ;;  %v2540_v18 = vpack.c.bf16 %v372_v50, %v369_v48  ;;  %v1622_v48 = vld [vmem:[%s4608_s3 + $0x90] sm:$0xff]  ;;  %v1623_v50 = vld [vmem:[%s4608_s3 + $0x98] sm:$0xff] }
  0x88   :  { %637 = vmatmul.mubr.f32.gmra.mrb[2].mxu0 %v70_v59  ;;  %v336_v59 = vld [vmem:[%s4606_s1 + $0x6d8] sm:$0xff] }
  0x89   :  { %2505 = vmatpush1.bf16.msra.mxu0 %v2504_v25  ;;  %642 = vmatprep.mubr.f32.mxu0 %v78_v7  ;;  %v2516_v46 = vpack.c.bf16 %v336_v59, %v333_v33  ;;  %v339_v7 = vld [vmem:[%s4606_s1 + $0x6f0] sm:$0xff] }
  0x8a   :  { %2315 = vmatmul.mubr.msk.f32.vlgmr.msra.gmra.mrb[64].mxu1 %vm428_vm0, %v74_v36  ;;  %2507 = vmatprep.subr.bf16.mxu0 %v2506_v58  ;;  %v337_v36 = vld [vmem:[%s4606_s1 + $0x6e0] sm:$0xff]  ;;  %v363_v58 = vld [vmem:[%s4606_s1 + $0x7b0] sm:$0xff] }
  0x8b   :  { %2317 = vmatprep.mubr.msk.f32.mxu1 %vm428_vm0, %v81_v54  ;;  %v2514_v54 = vpack.c.bf16 %v337_v36, %v334_v19  ;;  %v375_v19 = vld [vmem:[%s4606_s1 + $0x810] sm:$0xff]  ;;  %v378_v36 = vld [vmem:[%s4606_s1 + $0x828] sm:$0xff] }
  0x8c   :  { %643 = vmatmul.mubr.f32.gmra.mrb[4].mxu0 %v77_v28  ;;  %v342_v28 = vld [vmem:[%s4606_s1 + $0x708] sm:$0xff]  ;;  %v2544_v33 = vpack.c.bf16 %v378_v36, %v375_v19  ;;  %v1624_v19 = vld [vmem:[%s4608_s3 + $0xa0] sm:$0xff] }
  0x8d   :  { %2509 = vmatpush1.bf16.msra.mxu0 %v2508_v22  ;;  %648 = vmatprep.mubr.f32.mxu0 %v85_v42  ;;  %v2520_v20 = vpack.c.bf16 %v342_v28, %v339_v7  ;;  %v345_v42 = vld [vmem:[%s4606_s1 + $0x720] sm:$0xff]  ;;  %v376_v22 = vld [vmem:[%s4606_s1 + $0x818] sm:$0xff]  ;;  %v1625_v36 = vld [vmem:[%s4608_s3 + $0xa8] sm:$0xff] }
  0x8e   :  { %2318 = vmatmul.mubr.msk.f32.gmra.mrb[66].mxu1 %vm428_vm0, %v88_v5  ;;  %2511 = vmatprep.subr.bf16.mxu0 %v2510_v13  ;;  %v343_v5 = vld [vmem:[%s4606_s1 + $0x710] sm:$0xff] }
  0x8f   :  { %2320 = vmatprep.mubr.msk.f32.mxu1 %vm428_vm0, %v95_v21  ;;  %v2518_v21 = vpack.c.bf16 %v343_v5, %v340_v45  ;;  %v379_v13 = vld [vmem:[%s4606_s1 + $0x830] sm:$0xff]  ;;  %v381_v45 = vld [vmem:[%s4606_s1 + $0x840] sm:$0xff]  ;;  %v384_v5 = vld [vmem:[%s4606_s1 + $0x858] sm:$0xff] }
  0x90   :  { %649 = vmatmul.mubr.f32.gmra.mrb[6].mxu0 %v84_v1  ;;  %v348_v1 = vld [vmem:[%s4606_s1 + $0x738] sm:$0xff]  ;;  %v2542_v32 = vpack.c.bf16 %v379_v13, %v376_v22  ;;  %v2548_v7 = vpack.c.bf16 %v384_v5, %v381_v45  ;;  %v1606_v22 = vld [vmem:[%s4608_s3 + $0x10] sm:$0xff]  ;;  %v1609_v45 = vld [vmem:[%s4608_s3 + $0x28] sm:$0xff] }
  0x91   :  { %2513 = vmatpush1.bf16.msra.mxu0 %v2512_v14  ;;  %654 = vmatprep.mubr.f32.mxu0 %v92_v17  ;;  %v2526_v17 = vpack.c.bf16 %v355_v41, %v352_v55  ;;  %v382_v14 = vld [vmem:[%s4606_s1 + $0x848] sm:$0xff]  ;;  %v393_v55 = vld [vmem:[%s4606_s1 + $0x8a0] sm:$0xff]  ;;  %v396_v41 = vld [vmem:[%s4606_s1 + $0x8b8] sm:$0xff] }
  0x92   :  { %2321 = vmatmul.mubr.msk.f32.gmra.mrb[68].mxu1 %vm428_vm0, %v102_v35  ;;  %2515 = vmatprep.subr.bf16.mxu0 %v2514_v54  ;;  %v349_v35 = vld [vmem:[%s4606_s1 + $0x740] sm:$0xff]  ;;  %v1626_v5 = vld [vmem:[%s4608_s3 + $0xb0] sm:$0xff] }
  0x93   :  { %2323 = vmatprep.mubr.msk.f32.mxu1 %vm428_vm0, %v109_v52  ;;  %v2522_v52 = vpack.c.bf16 %v349_v35, %v346_v11  ;;  %v385_v54 = vld [vmem:[%s4606_s1 + $0x860] sm:$0xff]  ;;  %v387_v11 = vld [vmem:[%s4606_s1 + $0x870] sm:$0xff]  ;;  %v390_v35 = vld [vmem:[%s4606_s1 + $0x888] sm:$0xff] }
  0x94   :  { %655 = vmatmul.mubr.f32.gmra.mrb[8].mxu0 %v91_v43  ;;  %v351_v43 = vld [vmem:[%s4606_s1 + $0x750] sm:$0xff]  ;;  %v2546_v59 = vpack.c.bf16 %v385_v54, %v382_v14 }
  0x95   :  { %2517 = vmatpush1.bf16.msra.mxu0 %v2516_v46  ;;  %660 = vmatprep.mubr.f32.mxu0 %v99_v61  ;;  %v354_v61 = vld [vmem:[%s4606_s1 + $0x768] sm:$0xff]  ;;  %v388_v46 = vld [vmem:[%s4606_s1 + $0x878] sm:$0xff] }
  0x96   :  { %2324 = vmatmul.mubr.msk.f32.gmra.mrb[70].mxu1 %vm428_vm0, %v116_v4  ;;  %2519 = vmatprep.subr.bf16.mxu0 %v2518_v21  ;;  %v2524_v4 = vpack.c.bf16 %v348_v1, %v345_v42  ;;  %v391_v21 = vld [vmem:[%s4606_s1 + $0x890] sm:$0xff]  ;;  %v2552_v42 = vpack.c.bf16 %v390_v35, %v387_v11 }
  0x97   :  { %v2550_v28 = vpack.c.bf16 %v391_v21, %v388_v46  ;;  %v1627_v46 = vld [vmem:[%s4608_s3 + $0xb8] sm:$0xff]  ;;  %v1610_v35 = vld [vmem:[%s4608_s3 + $0x30] sm:$0xff] }
  0x98   :  { %661 = vmatmul.mubr.f32.gmra.mrb[10].mxu0 %v98_v23  ;;  %v361_v23 = vld [vmem:[%s4606_s1 + $0x7a0] sm:$0xff]  ;;  %v2678_v11 = vpack.c.bf16 %v1627_v46, %v1626_v5  ;;  %v1634_v5 = vld [vmem:[%s4608_s3 + $0xf0] sm:$0xff]  ;;  %v1635_v46 = vld [vmem:[%s4608_s3 + $0xf8] sm:$0xff] }
  0x99   :  { %2521 = vmatpush1.bf16.msra.mxu0 %v2520_v20  ;;  %666 = vmatprep.mubr.f32.mxu0 %v106_v40  ;;  %v2528_v40 = vpack.c.bf16 %v354_v61, %v351_v43  ;;  %v2530_v16 = vpack.c.bf16 %v361_v23, %v358_v31  ;;  %v394_v20 = vld [vmem:[%s4606_s1 + $0x8a8] sm:$0xff]  ;;  %v2556_v43 = vpack.c.bf16 %v396_v41, %v393_v55  ;;  %v399_v31 = vld [vmem:[%s4606_s1 + $0x8d0] sm:$0xff] }
  0x9a   :  { %2523 = vmatprep.subr.bf16.mxu0 %v2522_v52  ;;  %v397_v52 = vld [vmem:[%s4606_s1 + $0x8c0] sm:$0xff]  ;;  %v402_v23 = vld [vmem:[%s4606_s1 + $0x8e8] sm:$0xff] }
  0x9b   :  { %v2554_v1 = vpack.c.bf16 %v397_v52, %v394_v20  ;;  %v1611_v20 = vld [vmem:[%s4608_s3 + $0x38] sm:$0xff] }
  0x9c   :  { %667 = vmatmul.mubr.f32.gmra.mrb[12].mxu0 %v105_v8  ;;  %v367_v8 = vld [vmem:[%s4606_s1 + $0x7d0] sm:$0xff]  ;;  %v2680_v41 = vpack.c.bf16 %v1611_v20, %v1610_v35 }
  0x9d   :  { %2525 = vmatpush1.bf16.msra.mxu0 %v2524_v4  ;;  %672 = vmatprep.mubr.f32.mxu0 %v113_v24  ;;  %v2532_v24 = vpack.c.bf16 %v360_v38, %v357_v15  ;;  %v2534_v25 = vpack.c.bf16 %v367_v8, %v364_v12  ;;  %v400_v4 = vld [vmem:[%s4606_s1 + $0x8d8] sm:$0xff]  ;;  %v1620_v8 = vld [vmem:[%s4608_s3 + $0x80] sm:$0xff] }
  0x9e   :  { %2527 = vmatprep.subr.bf16.mxu0 %v2526_v17  ;;  %v403_v17 = vld [vmem:[%s4606_s1 + $0x8f0] sm:$0xff] }
  0x9f   :  { %v2558_v61 = vpack.c.bf16 %v403_v17, %v400_v4 }
  0xa0   :  { %673 = vmatmul.mubr.f32.gmra.mrb[14].mxu0 %v112_v51  ;;  %v373_v51 = vld [vmem:[%s4606_s1 + $0x800] sm:$0xff] }
  0xa1   :  { %2529 = vmatpush1.bf16.msra.mxu0 %v2528_v40  ;;  %743 = vmatprep.mubr.f32.mxu0 %v66_v29  ;;  %v2536_v29 = vpack.c.bf16 %v366_v57, %v363_v58  ;;  %v2538_v47 = vpack.c.bf16 %v373_v51, %v370_v60  ;;  %v2560_v40 = vpack.c.bf16 %v402_v23, %v399_v31  ;;  %v1604_v57 = vld [vmem:[%s4608_s3] sm:$0xff]  ;;  %v1605_v60 = vld [vmem:[%s4608_s3 + $0x8] sm:$0xff]  ;;  %v1630_v23 = vld [vmem:[%s4608_s3 + $0xd0] sm:$0xff] }
  0xa2   :  { %2531 = vmatprep.subr.bf16.mxu0 %v2530_v16 }
  0xa5   :  { %2533 = vmatpush1.bf16.msra.mxu0 %v2532_v24  ;;  %v1621_v24 = vld [vmem:[%s4608_s3 + $0x88] sm:$0xff] }
  0xa6   :  { %2535 = vmatprep.subr.bf16.mxu0 %v2534_v25  ;;  %v2666_v58 = vpack.c.bf16 %v1621_v24, %v1620_v8  ;;  %v1615_v8 = vld [vmem:[%s4608_s3 + $0x58] sm:$0xff] }
  0xa8   :  { %2667 = vmatprep.subr.bf16.mxu1 %v2666_v58 }
  0xa9   :  { %2537 = vmatpush1.bf16.msra.mxu0 %v2536_v29  ;;  %v2668_v29 = vpack.c.bf16 %v1605_v60, %v1604_v57 }
  0xaa   :  { %2539 = vmatprep.subr.bf16.mxu0 %v2538_v47 }
  0xab   :  { %2669 = vmatpush3.bf16.msra.mxu1 %v2668_v29 }
  0xad   :  { %2541 = vmatpush1.bf16.msra.mxu0 %v2540_v18  ;;  %v2670_v18 = vpack.c.bf16 %v1623_v50, %v1622_v48  ;;  %v1632_v50 = vld [vmem:[%s4608_s3 + $0xe0] sm:$0xff] }
  0xae   :  { %2543 = vmatprep.subr.bf16.mxu0 %v2542_v32  ;;  %v1607_v32 = vld [vmem:[%s4608_s3 + $0x18] sm:$0xff] }
  0xaf   :  { %v2672_v54 = vpack.c.bf16 %v1607_v32, %v1606_v22  ;;  %2671 = vmatprep.subr.bf16.mxu1 %v2670_v18  ;;  %v1633_v22 = vld [vmem:[%s4608_s3 + $0xe8] sm:$0xff] }
  0xb0   :  { %v2690_v32 = vpack.c.bf16 %v1633_v22, %v1632_v50 }
  0xb1   :  { %2545 = vmatpush1.bf16.msra.mxu0 %v2544_v33  ;;  %v2674_v33 = vpack.c.bf16 %v1625_v36, %v1624_v19  ;;  %2673 = vmatpush3.bf16.msra.mxu1 %v2672_v54  ;;  %v1616_v19 = vld [vmem:[%s4608_s3 + $0x60] sm:$0xff]  ;;  %v1617_v36 = vld [vmem:[%s4608_s3 + $0x68] sm:$0xff] }
  0xb2   :  { %2547 = vmatprep.subr.bf16.mxu0 %v2546_v59  ;;  %v1608_v59 = vld [vmem:[%s4608_s3 + $0x20] sm:$0xff] }
  0xb3   :  { %2675 = vmatprep.subr.bf16.mxu1 %v2674_v33  ;;  %v2692_v33 = vpack.c.bf16 %v1617_v36, %v1616_v19 }
  0xb5   :  { %2549 = vmatpush1.bf16.msra.mxu0 %v2548_v7  ;;  %v2676_v7 = vpack.c.bf16 %v1609_v45, %v1608_v59 }
  0xb6   :  { %2551 = vmatprep.subr.bf16.mxu0 %v2550_v28 }
  0xb7   :  { %2677 = vmatpush3.bf16.msra.mxu1 %v2676_v7  ;;  %v2694_v7 = vpack.c.bf16 %v1635_v46, %v1634_v5 }
  0xb8   :  { %2679 = vmatprep.subr.bf16.mxu1 %v2678_v11  ;;  %v1619_v11 = vld [vmem:[%s4608_s3 + $0x78] sm:$0xff] }
  0xb9   :  { %2553 = vmatpush1.bf16.msra.mxu0 %v2552_v42  ;;  %v1628_v42 = vld [vmem:[%s4608_s3 + $0xc0] sm:$0xff] }
  0xba   :  { %2555 = vmatprep.subr.bf16.mxu0 %v2554_v1  ;;  %v1629_v1 = vld [vmem:[%s4608_s3 + $0xc8] sm:$0xff] }
  0xbb   :  { %v2682_v17 = vpack.c.bf16 %v1629_v1, %v1628_v42  ;;  %2681 = vmatpush3.bf16.msra.mxu1 %v2680_v41 }
  0xbd   :  { %2557 = vmatpush1.bf16.msra.mxu0 %v2556_v43  ;;  %v1612_v43 = vld [vmem:[%s4608_s3 + $0x40] sm:$0xff]  ;;  %2683 = vmatprep.subr.bf16.mxu1 %v2682_v17 }
  0xbe   :  { %2559 = vmatprep.subr.bf16.mxu0 %v2558_v61  ;;  %v1613_v61 = vld [vmem:[%s4608_s3 + $0x48] sm:$0xff] }
  0xc1   :  { %2561 = vmatpush1.bf16.msra.mxu0 %v2560_v40  ;;  %v1631_v40 = vld [vmem:[%s4608_s3 + $0xd8] sm:$0xff] }
  0xc4   :  { %744 = vmatmul.mubr.f32.vlgmr.msra.gmra.mrb[0].mxu0 %v65_v30  ;;  %v4620_v30 = vunpack.c.l.bf16 %v3788_v44 }
  0xc5   :  { %749 = vmatprep.mubr.f32.mxu0 %v73_v39  ;;  %v4622_v39 = vunpack.c.l.bf16 %v3815_v3 }
  0xc8   :  { %750 = vmatmul.mubr.f32.gmra.mrb[2].mxu0 %v72_v0 }
  0xc9   :  { %755 = vmatprep.mubr.f32.mxu0 %v80_v63 }
  0xcc   :  { %756 = vmatmul.mubr.f32.gmra.mrb[4].mxu0 %v79_v37 }
  0xcd   :  { %761 = vmatprep.mubr.f32.mxu0 %v87_v27 }
  0xd0   :  { %762 = vmatmul.mubr.f32.gmra.mrb[6].mxu0 %v86_v62 }
  0xd1   :  { %767 = vmatprep.mubr.f32.mxu0 %v4619_v2  ;;  %v413_v2 = vlaneseq }
  0xd4   :  { %768 = vmatmul.mubr.f32.gmra.mrb[8].mxu0 %v4620_v30 }
  0xd5   :  { %773 = vmatprep.mubr.f32.mxu0 %v4621_v56  ;;  %v2684_v56 = vpack.c.bf16 %v1613_v61, %v1612_v43 }
  0xd7   :  { %2685 = vmatpush3.bf16.msra.mxu1 %v2684_v56 }
  0xd8   :  { %774 = vmatmul.mubr.f32.gmra.mrb[10].mxu0 %v4622_v39 }
  0xd9   :  { %779 = vmatprep.mubr.f32.mxu0 %v4623_v34  ;;  %v2686_v34 = vpack.c.bf16 %v1631_v40, %v1630_v23 }
  0xdb   :  { %2687 = vmatprep.subr.bf16.mxu1 %v2686_v34 }
  0xdc   :  { %780 = vmatmul.mubr.f32.gmra.mrb[12].mxu0 %v107_v10 }
  0xdd   :  { %v4146_v0 = vpop.f32.mrb[0].mxu1  ;;  %785 = vmatprep.mubr.f32.mxu0 %v115_v26 }
  0xde   :  { %v4150_v63 = vpop.f32.mrb[1].mxu1 }
  0xe0   :  { %786 = vmatmul.mubr.f32.gmra.mrb[14].mxu0 %v114_v9 }
  0xe1   :  { %v4154_v49 = vpop.f32.mrb[2].mxu1 }
  0xe2   :  { %v4156_v37 = vpop.f32.mrb[3].mxu1 }
  0xe5   :  { %v4158_v27 = vpop.f32.mrb[4].mxu1 }
  0xe6   :  { %v4160_v44 = vpop.f32.mrb[5].mxu1 }
  0xe9   :  { %v4162_v62 = vpop.f32.mrb[6].mxu1 }
  0xea   :  { %v4164_v3 = vpop.f32.mrb[7].mxu1 }
  0xed   :  { %v4166_v53 = vpop.f32.mrb[8].mxu1 }
  0xee   :  { %v4168_v10 = vpop.f32.mrb[9].mxu1 }
  0xf1   :  { %v4170_v26 = vpop.f32.mrb[10].mxu1 }
  0xf2   :  { %v4172_v6 = vpop.f32.mrb[11].mxu1 }
  0xf5   :  { %v4174_v9 = vpop.f32.mrb[12].mxu1 }
  0xf6   :  { %v4176_v16 = vpop.f32.mrb[13].mxu1 }
  0xf9   :  { %v4178_v15 = vpop.f32.mrb[14].mxu1 }
  0xfa   :  { %v4180_v38 = vpop.f32.mrb[15].mxu1 }
  0xfd   :  { %v2084_v12 = vpop.f32.mrb[16].mxu1 }
  0xfe   :  { %v2085_v25 = vpop.f32.mrb[17].mxu1 }
  0xff   :  { %v4194_v51 = vadd.f32 %v2085_v25, %v2084_v12  ;;  %v1614_v12 = vld [vmem:[%s4608_s3 + $0x50] sm:$0xff]  ;;  %v4260_v25 = vshrl.u32 %v413_v2, 7 }
 0x100   :  { %v2688_v57 = vpack.c.bf16 %v1615_v8, %v1614_v12 }
 0x101   :  { %v2087_v47 = vpop.f32.mrb[18].mxu1 }
 0x102   :  { %v2088_v13 = vpop.f32.mrb[19].mxu1  ;;  %2689 = vmatpush3.bf16.msra.mxu1 %v2688_v57 }
 0x103   :  { %v4214_v14 = vadd.f32 %v2088_v13, %v2087_v47  ;;  %v423_v47 = vsub.s32 2, %v4260_v25  ;;  %v4272_v13 = vld [vmem:[%s4609_s2] sm:$0x7]  ;;  %2691 = vmatprep.subr.bf16.mxu1 %v2690_v32 }
 0x105   :  { %v2090_v21 = vpop.f32.mrb[20].mxu1  ;;  %v424_v59 = vrot.slane %v4272_v13, %v423_v47 }
 0x106   :  { %v2091_v28 = vpop.f32.mrb[21].mxu1  ;;  %2693 = vmatpush3.bf16.msra.mxu1 %v2692_v33 }
 0x107   :  { %v4234_v52 = vadd.f32 %v2091_v28, %v2090_v21  ;;  %v1618_v28 = vld [vmem:[%s4608_s3 + $0x70] sm:$0xff]  ;;  %2695 = vmatprep.subr.bf16.mxu1 %v2694_v7  ;;  %v972_v42 = vadd.f32 %v4194_v51, %v424_v59 }
 0x108   :  { %v2696_v20 = vpack.c.bf16 %v1619_v11, %v1618_v28 }
 0x109   :  { %v2093_v55 = vpop.f32.mrb[22].mxu1  ;;  %v982_v40 = vadd.f32 %v4234_v52, %v424_v59  ;;  %v1637_v52 = vld [vmem:[%s4608_s3 + $0x108] sm:$0xff] }
 0x10a   :  { %v2094_v4 = vpop.f32.mrb[23].mxu1  ;;  %2697 = vmatpush3.bf16.msra.mxu1 %v2696_v20 }
 0x10b   :  { %v2095_v31 = vadd.f32 %v2094_v4, %v2093_v55  ;;  %v977_v4 = vadd.f32 %v4214_v14, %v424_v59  ;;  %v1636_v14 = vld [vmem:[%s4608_s3 + $0x100] sm:$0xff] }
 0x10c   :  { %v4302_v50 = vpack.c.bf16 %v1637_v52, %v1636_v14 }
 0x10d   :  { %v2096_v30 = vpop.f32.mrb[24].mxu1  ;;  %v987_v34 = vadd.f32 %v2095_v31, %v424_v59 }
 0x10e   :  { %v2097_v39 = vpop.f32.mrb[25].mxu1  ;;  %2699 = vmatprep.subr.bf16.mxu1 %v4302_v50 }
 0x10f   :  { %v2098_v24 = vadd.f32 %v2097_v39, %v2096_v30 }
 0x111   :  { %v2099_v58 = vpop.f32.mrb[26].mxu1  ;;  %v992_v57 = vadd.f32 %v2098_v24, %v424_v59 }
 0x112   :  { %v2100_v60 = vpop.f32.mrb[27].mxu1 }
 0x113   :  { %v2101_v29 = vadd.f32 %v2100_v60, %v2099_v58 }
 0x115   :  { %v2102_v48 = vpop.f32.mrb[28].mxu1  ;;  %v997_v31 = vadd.f32 %v2101_v29, %v424_v59 }
 0x116   :  { %v2103_v18 = vpop.f32.mrb[29].mxu1 }
 0x117   :  { %v2104_v54 = vadd.f32 %v2103_v18, %v2102_v48 }
 0x119   :  { %v2105_v45 = vpop.f32.mrb[30].mxu1  ;;  %v1002_v36 = vadd.f32 %v2104_v54, %v424_v59 }
 0x11a   :  { %v2106_v21 = vpop.f32.mrb[31].mxu1 }
 0x11b   :  { %v2107_v35 = vadd.f32 %v2106_v21, %v2105_v45 }
 0x11d   :  { %v2140_v1 = vpop.f32.mrb[32].mxu1  ;;  %v1007_v21 = vadd.f32 %v2107_v35, %v424_v59 }
 0x11e   :  { %v2141_v55 = vpop.f32.mrb[33].mxu1 }
 0x11f   :  { %v2142_v41 = vadd.f32 %v2141_v55, %v2140_v1 }
 0x121   :  { %v1077_v17 = vadd.f32 %v2142_v41, %v972_v42  ;;  %v2143_v43 = vpop.f32.mrb[34].mxu1 }
 0x122   :  { %v2144_v61 = vpop.f32.mrb[35].mxu1 }
 0x123   :  { %v2145_v23 = vadd.f32 %v2144_v61, %v2143_v43 }
 0x125   :  { %v1082_v2 = vadd.f32 %v2145_v23, %v977_v4  ;;  %v2146_v30 = vpop.f32.mrb[36].mxu1 }
 0x126   :  { %v2147_v56 = vpop.f32.mrb[37].mxu1 }
 0x127   :  { %v2148_v39 = vadd.f32 %v2147_v56, %v2146_v30 }
 0x129   :  { %v1087_v12 = vadd.f32 %v2148_v39, %v982_v40  ;;  %v2149_v8 = vpop.f32.mrb[38].mxu1 }
 0x12a   :  { %v2150_v51 = vpop.f32.mrb[39].mxu1 }
 0x12b   :  { %v2151_v58 = vadd.f32 %v2150_v51, %v2149_v8 }
 0x12d   :  { %v1092_v60 = vadd.f32 %v2151_v58, %v987_v34  ;;  %v2152_v47 = vpop.f32.mrb[40].mxu1 }
 0x12e   :  { %v2153_v48 = vpop.f32.mrb[41].mxu1 }
 0x12f   :  { %v2154_v22 = vadd.f32 %v2153_v48, %v2152_v47 }
 0x131   :  { %v1097_v18 = vadd.f32 %v2154_v22, %v992_v57  ;;  %v2155_v32 = vpop.f32.mrb[42].mxu1 }
 0x132   :  { %v2156_v24 = vpop.f32.mrb[43].mxu1 }
 0x133   :  { %v2157_v19 = vadd.f32 %v2156_v24, %v2155_v32 }
 0x135   :  { %v1102_v33 = vadd.f32 %v2157_v19, %v997_v31  ;;  %v2158_v45 = vpop.f32.mrb[44].mxu1 }
 0x136   :  { %v2159_v5 = vpop.f32.mrb[45].mxu1 }
 0x137   :  { %v2160_v46 = vadd.f32 %v2159_v5, %v2158_v45 }
 0x139   :  { %v1107_v7 = vadd.f32 %v2160_v46, %v1002_v36  ;;  %v2161_v28 = vpop.f32.mrb[46].mxu1 }
 0x13a   :  { %v2162_v11 = vpop.f32.mrb[47].mxu1 }
 0x13b   :  { %v2163_v20 = vadd.f32 %v2162_v11, %v2161_v28 }
 0x13d   :  { %v1112_v42 = vadd.f32 %v2163_v20, %v1007_v21  ;;  %v2196_v1 = vpop.f32.mrb[48].mxu1  ;;  %v4624_v21 = vmov 0.0  }
 0x13e   :  { %v2197_v55 = vpop.f32.mrb[49].mxu1 }
 0x13f   :  { %v2198_v41 = vadd.f32 %v2197_v55, %v2196_v1 }
 0x141   :  { %v2199_v4 = vpop.f32.mrb[50].mxu1  ;;  %v1182_v29 = vadd.f32 %v2198_v41, %v1077_v17 }
 0x142   :  { %v2200_v43 = vpop.f32.mrb[51].mxu1 }
 0x143   :  { %v2201_v61 = vadd.f32 %v2200_v43, %v2199_v4 }
 0x145   :  { %v2202_v23 = vpop.f32.mrb[52].mxu1  ;;  %v1187_v40 = vadd.f32 %v2201_v61, %v1082_v2 }
 0x146   :  { %v2203_v54 = vpop.f32.mrb[53].mxu1 }
 0x147   :  { %v2204_v30 = vadd.f32 %v2203_v54, %v2202_v23 }
 0x149   :  { %v2205_v56 = vpop.f32.mrb[54].mxu1  ;;  %v1192_v39 = vadd.f32 %v2204_v30, %v1087_v12 }
 0x14a   :  { %v2206_v34 = vpop.f32.mrb[55].mxu1 }
 0x14b   :  { %v2207_v59 = vadd.f32 %v2206_v34, %v2205_v56 }
 0x14d   :  { %v2208_v35 = vpop.f32.mrb[56].mxu1  ;;  %v1197_v8 = vadd.f32 %v2207_v59, %v1092_v60 }
 0x14e   :  { %v2209_v51 = vpop.f32.mrb[57].mxu1 }
 0x14f   :  { %v2210_v58 = vadd.f32 %v2209_v51, %v2208_v35 }
 0x151   :  { %v2211_v57 = vpop.f32.mrb[58].mxu1  ;;  %v1202_v47 = vadd.f32 %v2210_v58, %v1097_v18 }
 0x152   :  { %v2212_v14 = vpop.f32.mrb[59].mxu1 }
 0x153   :  { %v2213_v52 = vadd.f32 %v2212_v14, %v2211_v57 }
 0x155   :  { %v2214_v48 = vpop.f32.mrb[60].mxu1  ;;  %v1207_v17 = vadd.f32 %v2213_v52, %v1102_v33 }
 0x156   :  { %v2215_v22 = vpop.f32.mrb[61].mxu1 }
 0x157   :  { %v2216_v31 = vadd.f32 %v2215_v22, %v2214_v48 }
 0x159   :  { %v2217_v32 = vpop.f32.mrb[62].mxu1  ;;  %v1212_v2 = vadd.f32 %v2216_v31, %v1107_v7 }
 0x15a   :  { %v2218_v24 = vpop.f32.mrb[63].mxu1 }
 0x15b   :  { %v2219_v19 = vadd.f32 %v2218_v24, %v2217_v32 }
 0x15d   :  { %v2316_v36 = vpop.f32.mrb[64].mxu1  ;;  %v1217_v12 = vadd.f32 %v2219_v19, %v1112_v42 }
 0x15e   :  { %v1292_v45 = vadd.f32 %v2316_v36, %v1187_v40  ;;  %v1286_v5 = vpop.f32.mrb[65].mxu1 }
 0x15f   :  { %v4305_v46 = vadd.f32 %v1286_v5, %v1182_v29 }
 0x161   :  { %vm1378_vm1 = vcmp.gt.f32.partialorder %v4305_v46, 1.0  ;;  %v1396_v60 = vmul.f32 0.9, %v4305_v46  ;;  %v2319_v18 = vpop.f32.mrb[66].mxu1 }
 0x162   :  { %v1983_v33 = vsel %vm1378_vm1, 1.0, %v4624_v21  ;;  %v1302_v28 = vadd.f32 %v2319_v18, %v1197_v8  ;;  %v1296_v11 = vpop.f32.mrb[67].mxu1 }
 0x163   :  { %v1399_v7 = vadd.f32 %v1396_v60, %v1292_v45  ;;  %v1297_v20 = vadd.f32 %v1296_v11, %v1192_v39  ;;  %v419_v45 = vsub.s32 1, %v4260_v25 }
 0x165   :  { %v4312_v1 = vsub.f32 %v1399_v7, %v1983_v33  ;;  %v2322_v42 = vpop.f32.mrb[68].mxu1  ;;  %v4366_v60 = vrot.slane %v4272_v13, %v419_v45 }
 0x166   :  { %v1312_v55 = vadd.f32 %v2322_v42, %v1207_v17  ;;  %v1306_v41 = vpop.f32.mrb[69].mxu1 }
 0x167   :  { %vm1405_vm2 = vcmp.gt.f32.partialorder %v4312_v1, 1.0  ;;  %v1423_v4 = vmul.f32 0.9, %v4312_v1  ;;  %v1307_v29 = vadd.f32 %v1306_v41, %v1202_v47 }
 0x168   :  { %v1986_v43 = vsel %vm1405_vm2, 1.0, %v4624_v21 }
 0x169   :  { %v1426_v61 = vadd.f32 %v1423_v4, %v1297_v20  ;;  %v2325_v23 = vpop.f32.mrb[70].mxu1  ;;  %v1638_v20 = vld [vmem:[%s4608_s3 + $0x110] sm:$0xff] }
 0x16a   :  { %v1322_v40 = vadd.f32 %v2325_v23, %v1217_v12  ;;  %v1316_v54 = vpop.f32.mrb[71].mxu1  ;;  %v415_v12 = vsub.s32 0, %v4260_v25  ;;  %v1639_v25 = vld [vmem:[%s4608_s3 + $0x118] sm:$0xff]  ;;  %v1641_v23 = vld [vmem:[%s4608_s3 + $0x128] sm:$0xff] }
 0x16b   :  { %v4319_v30 = vsub.f32 %v1426_v61, %v1986_v43  ;;  %v1317_v56 = vadd.f32 %v1316_v54, %v1212_v2  ;;  %v2797_v61 = vmov 1.0  }
 0x16c   :  { %v4363_v5 = vrot.slane %v4272_v13, %v415_v12 }
 0x16d   :  { %vm1432_vm3 = vcmp.gt.f32.partialorder %v4319_v30, 1.0  ;;  %v1450_v39 = vmul.f32 0.9, %v4319_v30 }
 0x16e   :  { %v1989_v34 = vsel %vm1432_vm3, 1.0, %v4624_v21 }
 0x16f   :  { %v1453_v59 = vadd.f32 %v1450_v39, %v1302_v28 }
 0x171   :  { %v4326_v35 = vsub.f32 %v1453_v59, %v1989_v34 }
 0x173   :  { %vm1459_vm4 = vcmp.gt.f32.partialorder %v4326_v35, 1.0  ;;  %v1477_v8 = vmul.f32 0.9, %v4326_v35 }
 0x174   :  { %v1992_v51 = vsel %vm1459_vm4, 1.0, %v4624_v21 }
 0x175   :  { %v1480_v58 = vadd.f32 %v1477_v8, %v1307_v29  ;;  %v2702_v29 = vpack.c.bf16 %v1639_v25, %v1638_v20 }
 0x177   :  { %v4333_v57 = vsub.f32 %v1480_v58, %v1992_v51 }
 0x179   :  { %vm1486_vm5 = vcmp.gt.f32.partialorder %v4333_v57, 1.0  ;;  %v1504_v47 = vmul.f32 0.9, %v4333_v57 }
 0x17a   :  { %v1995_v14 = vsel %vm1486_vm5, 1.0, %v4624_v21 }
 0x17b   :  { %v1507_v52 = vadd.f32 %v1504_v47, %v1312_v55 }
 0x17d   :  { %v4340_v48 = vsub.f32 %v1507_v52, %v1995_v14  ;;  %v1642_v52 = vld [vmem:[%s4608_s3 + $0x130] sm:$0xff] }
 0x17f   :  { %v1531_v17 = vmul.f32 0.9, %v4340_v48  ;;  %vm1513_vm6 = vcmp.gt.f32.partialorder %v4340_v48, 1.0 }
 0x180   :  { %v1998_v22 = vsel %vm1513_vm6, 1.0, %v4624_v21 }
 0x181   :  { %v1534_v31 = vadd.f32 %v1531_v17, %v1317_v56 }
 0x183   :  { %v4347_v32 = vsub.f32 %v1534_v31, %v1998_v22 }
 0x185   :  { %vm1540_vm7 = vcmp.gt.f32.partialorder %v4347_v32, 1.0  ;;  %v1558_v2 = vmul.f32 0.9, %v4347_v32 }
 0x186   :  { %v4354_v24 = vsel %vm1540_vm7, 1.0, %v4624_v21 }
 0x187   :  { %v4356_v19 = vadd.f32 %v1558_v2, %v1322_v40 }
 0x189   :  { %v1564_v36 = vsub.f32 %v4356_v19, %v4354_v24 }
 0x197   :  { %v745_v18 = vpop.f32.mrb[0].mxu0 }
 0x198   :  { %v2730_v33 = vadd.f32 %v745_v18, %v4363_v5  ;;  %v747_v28 = vpop.f32.mrb[1].mxu0 }
 0x199   :  { %v2732_v11 = vadd.f32 %v747_v28, %v4366_v60 }
 0x19a   :  { %v2731_v7 = vadd.f32 %v2730_v33, %v4146_v0 }
 0x19b   :  { %v2733_v42 = vadd.f32 %v2732_v11, %v4150_v63  ;;  %v751_v13 = vpop.f32.mrb[2].mxu0  ;;  %v1640_v63 = vld [vmem:[%s4608_s3 + $0x120] sm:$0xff] }
 0x19c   :  { %v2734_v55 = vadd.f32 %v751_v13, %v4363_v5  ;;  %v753_v41 = vpop.f32.mrb[3].mxu0  ;;  %vm1376_vm9 = vcmp.gt.f32.partialorder %v2731_v7, 1.0  ;;  %v1394_v0 = vmul.f32 0.9, %v2731_v7  ;;  %v2706_v58 = vpack.c.bf16 %v1641_v23, %v1640_v63  ;;  %v1645_v7 = vld [vmem:[%s4608_s3 + $0x148] sm:$0xff]  ;;  %v1646_v23 = vld [vmem:[%s4608_s3 + $0x150] sm:$0xff] }
 0x19d   :  { %v2736_v4 = vadd.f32 %v753_v41, %v4366_v60  ;;  %vm1377_vm8 = vcmp.gt.f32.partialorder %v2733_v42, 1.0  ;;  %v1395_v40 = vmul.f32 0.9, %v2733_v42  ;;  %v1981_v59 = vsel %vm1376_vm9, 1.0, %v4624_v21 }
 0x19e   :  { %v2735_v43 = vadd.f32 %v2734_v55, %v4154_v49  ;;  %2028 = vmatprep.mubr.msk.f32.mxu1 %vm1377_vm8, %v2797_v61 }
 0x19f   :  { %v2737_v54 = vadd.f32 %v2736_v4, %v4156_v37  ;;  %v757_v56 = vpop.f32.mrb[4].mxu0  ;;  %2029 = vmatmul.mubr.msk.f32.vlgmr.msra.gmra.mrb[72].mxu1 %vm1376_vm9, %v2797_v61  ;;  %v1982_v37 = vsel %vm1377_vm8, 1.0, %v4624_v21 }
 0x1a0   :  { %v1397_v39 = vadd.f32 %v2735_v43, %v1394_v0  ;;  %v2738_v49 = vadd.f32 %v757_v56, %v4363_v5  ;;  %v759_v34 = vpop.f32.mrb[5].mxu0  ;;  %2701 = vmatpush3.bf16.msra.mxu1 %v4302_v50  ;;  %v1643_v50 = vld [vmem:[%s4608_s3 + $0x138] sm:$0xff] }
 0x1a1   :  { %v1398_v8 = vadd.f32 %v2737_v54, %v1395_v40  ;;  %v2740_v51 = vadd.f32 %v759_v34, %v4366_v60  ;;  %2703 = vmatprep.subr.bf16.mxu1 %v2702_v29  ;;  %v2710_v33 = vpack.c.bf16 %v1643_v50, %v1642_v52  ;;  %v1647_v40 = vld [vmem:[%s4608_s3 + $0x158] sm:$0xff]  ;;  %v1649_v52 = vld [vmem:[%s4608_s3 + $0x168] sm:$0xff] }
 0x1a2   :  { %v1400_v47 = vsub.f32 %v1397_v39, %v1981_v59  ;;  %v2739_v14 = vadd.f32 %v2738_v49, %v4158_v27 }
 0x1a3   :  { %v1401_v17 = vsub.f32 %v1398_v8, %v1982_v37  ;;  %v2741_v22 = vadd.f32 %v2740_v51, %v4160_v44  ;;  %v763_v31 = vpop.f32.mrb[6].mxu0  ;;  %v1644_v44 = vld [vmem:[%s4608_s3 + $0x140] sm:$0xff] }
 0x1a4   :  { %v1421_v2 = vmul.f32 0.9, %v1400_v47  ;;  %v2742_v12 = vadd.f32 %v763_v31, %v4363_v5  ;;  %v765_v45 = vpop.f32.mrb[7].mxu0  ;;  %vm1403_vm10 = vcmp.gt.f32.partialorder %v1400_v47, 1.0  ;;  %2705 = vmatpush3.bf16.msra.mxu1 %v2702_v29  ;;  %v2714_v43 = vpack.c.bf16 %v1645_v7, %v1644_v44 }
 0x1a5   :  { %v1422_v18 = vmul.f32 0.9, %v1401_v17  ;;  %v2744_v27 = vadd.f32 %v765_v45, %v4366_v60  ;;  %vm1404_vm11 = vcmp.gt.f32.partialorder %v1401_v17, 1.0  ;;  %2707 = vmatprep.subr.bf16.mxu1 %v2706_v58  ;;  %v1984_v13 = vsel %vm1403_vm10, 1.0, %v4624_v21 }
 0x1a6   :  { %v1424_v28 = vadd.f32 %v2739_v14, %v1421_v2  ;;  %v2743_v11 = vadd.f32 %v2742_v12, %v4162_v62  ;;  %2030 = vmatprep.mubr.msk.f32.mxu1 %vm1404_vm11, %v2797_v61  ;;  %v1985_v62 = vsel %vm1404_vm11, 1.0, %v4624_v21  ;;  %v1648_v14 = vld [vmem:[%s4608_s3 + $0x160] sm:$0xff] }
 0x1a7   :  { %v1425_v20 = vadd.f32 %v2741_v22, %v1422_v18  ;;  %v2745_v25 = vadd.f32 %v2744_v27, %v4164_v3  ;;  %v769_v42 = vpop.f32.mrb[8].mxu0  ;;  %2031 = vmatmul.mubr.msk.f32.gmra.mrb[74].mxu1 %vm1403_vm10, %v2797_v61  ;;  %v2722_v18 = vpack.c.bf16 %v1649_v52, %v1648_v14 }
 0x1a8   :  { %v2746_v55 = vadd.f32 %v769_v42, %v4363_v5  ;;  %v771_v41 = vpop.f32.mrb[9].mxu0  ;;  %v1427_v4 = vsub.f32 %v1424_v28, %v1984_v13  ;;  %2709 = vmatpush3.bf16.msra.mxu1 %v2706_v58  ;;  %v2718_v58 = vpack.c.bf16 %v1647_v40, %v1646_v23  ;;  %v1651_v28 = vld [vmem:[%s4608_s3 + $0x178] sm:$0xff] }
 0x1a9   :  { %v2748_v29 = vadd.f32 %v771_v41, %v4366_v60  ;;  %v1428_v0 = vsub.f32 %v1425_v20, %v1985_v62  ;;  %2711 = vmatprep.subr.bf16.mxu1 %v2710_v33 }
 0x1aa   :  { %v2747_v3 = vadd.f32 %v2746_v55, %v4166_v53  ;;  %vm1430_vm12 = vcmp.gt.f32.partialorder %v1427_v4, 1.0  ;;  %v1448_v63 = vmul.f32 0.9, %v1427_v4 }
 0x1ab   :  { %v2749_v54 = vadd.f32 %v2748_v29, %v4168_v10  ;;  %v775_v56 = vpop.f32.mrb[10].mxu0  ;;  %vm1431_vm13 = vcmp.gt.f32.partialorder %v1428_v0, 1.0  ;;  %v1449_v39 = vmul.f32 0.9, %v1428_v0  ;;  %v1987_v8 = vsel %vm1430_vm12, 1.0, %v4624_v21 }
 0x1ac   :  { %v2750_v49 = vadd.f32 %v775_v56, %v4363_v5  ;;  %v777_v34 = vpop.f32.mrb[11].mxu0  ;;  %2032 = vmatprep.mubr.msk.f32.mxu1 %vm1431_vm13, %v2797_v61  ;;  %v1451_v53 = vadd.f32 %v2743_v11, %v1448_v63  ;;  %2713 = vmatpush3.bf16.msra.mxu1 %v2710_v33  ;;  %v1988_v47 = vsel %vm1431_vm13, 1.0, %v4624_v21 }
 0x1ad   :  { %v2752_v59 = vadd.f32 %v777_v34, %v4366_v60  ;;  %2033 = vmatmul.mubr.msk.f32.gmra.mrb[76].mxu1 %vm1430_vm12, %v2797_v61  ;;  %v1452_v51 = vadd.f32 %v2745_v25, %v1449_v39  ;;  %2715 = vmatprep.subr.bf16.mxu1 %v2714_v43 }
 0x1ae   :  { %v2751_v10 = vadd.f32 %v2750_v49, %v4170_v26  ;;  %v1454_v37 = vsub.f32 %v1451_v53, %v1987_v8 }
 0x1af   :  { %v2753_v50 = vadd.f32 %v2752_v59, %v4172_v6  ;;  %v781_v17 = vpop.f32.mrb[12].mxu0  ;;  %v1455_v22 = vsub.f32 %v1452_v51, %v1988_v47  ;;  %v1650_v6 = vld [vmem:[%s4608_s3 + $0x170] sm:$0xff] }
 0x1b0   :  { %v2754_v31 = vadd.f32 %v781_v17, %v4363_v5  ;;  %v783_v2 = vpop.f32.mrb[13].mxu0  ;;  %vm1457_vm14 = vcmp.gt.f32.partialorder %v1454_v37, 1.0  ;;  %v1475_v26 = vmul.f32 0.9, %v1454_v37  ;;  %2717 = vmatpush3.bf16.msra.mxu1 %v2714_v43 }
 0x1b1   :  { %v2756_v12 = vadd.f32 %v783_v2, %v4366_v60  ;;  %vm1458_vm15 = vcmp.gt.f32.partialorder %v1455_v22, 1.0  ;;  %v1476_v45 = vmul.f32 0.9, %v1455_v22  ;;  %2719 = vmatprep.subr.bf16.mxu1 %v2718_v58  ;;  %v1990_v7 = vsel %vm1457_vm14, 1.0, %v4624_v21 }
 0x1b2   :  { %v2755_v27 = vadd.f32 %v2754_v31, %v4174_v9  ;;  %2034 = vmatprep.mubr.msk.f32.mxu1 %vm1458_vm15, %v2797_v61  ;;  %v1478_v33 = vadd.f32 %v2747_v3, %v1475_v26  ;;  %v1991_v20 = vsel %vm1458_vm15, 1.0, %v4624_v21 }
 0x1b3   :  { %v2757_v11 = vadd.f32 %v2756_v12, %v4176_v16  ;;  %v787_v44 = vpop.f32.mrb[14].mxu0  ;;  %2035 = vmatmul.mubr.msk.f32.gmra.mrb[78].mxu1 %vm1457_vm14, %v2797_v61  ;;  %v1479_v9 = vadd.f32 %v2749_v54, %v1476_v45  ;;  %v2726_v16 = vpack.c.bf16 %v1651_v28, %v1650_v6 }
 0x1b4   :  { %v2758_v25 = vadd.f32 %v787_v44, %v4363_v5  ;;  %v789_v42 = vpop.f32.mrb[15].mxu0  ;;  %v1481_v13 = vsub.f32 %v1478_v33, %v1990_v7  ;;  %2721 = vmatpush3.bf16.msra.mxu1 %v2718_v58  ;;  %v2005_v33 = vld [vmem:[%s4610_s4] ss:$0 sm:$0xff] }
 0x1b5   :  { %v2760_v62 = vadd.f32 %v789_v42, %v4366_v60  ;;  %v1482_v55 = vsub.f32 %v1479_v9, %v1991_v20  ;;  %2723 = vmatprep.subr.bf16.mxu1 %v2722_v18 }
 0x1b6   :  { %v2759_v41 = vadd.f32 %v2758_v25, %v4178_v15  ;;  %vm1484_vm0 = vcmp.gt.f32.partialorder %v1481_v13, 1.0  ;;  %v1502_v4 = vmul.f32 0.9, %v1481_v13 }
 0x1b7   :  { %v2761_v29 = vadd.f32 %v2760_v62, %v4180_v38  ;;  %vm1485_vm8 = vcmp.gt.f32.partialorder %v1482_v55, 1.0  ;;  %v1503_v0 = vmul.f32 0.9, %v1482_v55  ;;  %v1993_v5 = vsel %vm1484_vm0, 1.0, %v4624_v21 }
 0x1b8   :  { %2036 = vmatprep.mubr.msk.f32.mxu1 %vm1485_vm8, %v2797_v61  ;;  %v1505_v43 = vadd.f32 %v2751_v10, %v1502_v4  ;;  %2725 = vmatpush3.bf16.msra.mxu1 %v2722_v18  ;;  %v1994_v3 = vsel %vm1485_vm8, 1.0, %v4624_v21 }
 0x1b9   :  { %2037 = vmatmul.mubr.msk.f32.gmra.mrb[80].mxu1 %vm1484_vm0, %v2797_v61  ;;  %v1506_v60 = vadd.f32 %v2753_v50, %v1503_v0  ;;  %2727 = vmatprep.subr.bf16.mxu1 %v2726_v16 }
 0x1ba   :  { %v1508_v63 = vsub.f32 %v1505_v43, %v1993_v5 }
 0x1bb   :  { %v1509_v15 = vsub.f32 %v1506_v60, %v1994_v3 }
 0x1bc   :  { %vm1511_vm9 = vcmp.gt.f32.partialorder %v1508_v63, 1.0  ;;  %v1529_v23 = vmul.f32 0.9, %v1508_v63  ;;  %2729 = vmatpush3.bf16.msra.mxu1 %v2726_v16 }
 0x1bd   :  { %vm1512_vm10 = vcmp.gt.f32.partialorder %v1509_v15, 1.0  ;;  %v1530_v38 = vmul.f32 0.9, %v1509_v15  ;;  %v1996_v54 = vsel %vm1511_vm9, 1.0, %v4624_v21 }
 0x1be   :  { %2038 = vmatprep.mubr.msk.f32.mxu1 %vm1512_vm10, %v2797_v61  ;;  %v1532_v40 = vadd.f32 %v2755_v27, %v1529_v23  ;;  %v1997_v39 = vsel %vm1512_vm10, 1.0, %v4624_v21 }
 0x1bf   :  { %2039 = vmatmul.mubr.msk.f32.gmra.mrb[82].mxu1 %vm1511_vm9, %v2797_v61  ;;  %v1533_v56 = vadd.f32 %v2757_v11, %v1530_v38 }
 0x1c0   :  { %v1535_v49 = vsub.f32 %v1532_v40, %v1996_v54 }
 0x1c1   :  { %v1536_v34 = vsub.f32 %v1533_v56, %v1997_v39 }
 0x1c2   :  { %vm1538_vm11 = vcmp.gt.f32.partialorder %v1535_v49, 1.0  ;;  %v1556_v53 = vmul.f32 0.9, %v1535_v49 }
 0x1c3   :  { %vm1539_vm12 = vcmp.gt.f32.partialorder %v1536_v34, 1.0  ;;  %v1557_v59 = vmul.f32 0.9, %v1536_v34  ;;  %v1999_v51 = vsel %vm1538_vm11, 1.0, %v4624_v21 }
 0x1c4   :  { %2040 = vmatprep.mubr.msk.f32.mxu1 %vm1539_vm12, %v2797_v61  ;;  %v1559_v8 = vadd.f32 %v2759_v41, %v1556_v53  ;;  %v2000_v10 = vsel %vm1539_vm12, 1.0, %v4624_v21 }
 0x1c5   :  { %2041 = vmatmul.mubr.msk.f32.gmra.mrb[84].mxu1 %vm1538_vm11, %v2797_v61  ;;  %v1560_v58 = vadd.f32 %v2761_v29, %v1557_v59 }
 0x1c6   :  { %v1562_v47 = vsub.f32 %v1559_v8, %v1999_v51 }
 0x1c7   :  { %v1563_v37 = vsub.f32 %v1560_v58, %v2000_v10 }
 0x1c8   :  { %vm1565_vm14 = vcmp.gt.f32.partialorder %v1562_v47, 1.0 }
 0x1c9   :  { %vm1566_vm13 = vcmp.gt.f32.partialorder %v1563_v37, 1.0 }
 0x1ca   :  { %2042 = vmatprep.mubr.msk.f32.mxu1 %vm1566_vm13, %v2797_v61 }
 0x1cb   :  { %2043 = vmatmul.mubr.msk.f32.gmra.mrb[86].mxu1 %vm1565_vm14, %v2797_v61 }
 0x1cc   :  { %2358 = vmatprep.mubr.msk.f32.mxu1 %vm1378_vm1, %v2797_v61  ;;  %vm1567_vm1 = vcmp.gt.f32.partialorder %v1564_v36, 1.0 }
 0x1cf   :  { %2359 = vmatmul.mubr.msk.f32.vlgmr.msra.gmra.mrb[88].mxu1 %vm1405_vm2, %v2797_v61  ;;  %vm27_vm2 = vcmask 80896  }
 0x1d0   :  { %2361 = vmatprep.mubr.msk.f32.mxu1 %vm1432_vm3, %v2797_v61  ;;  %28 = vst.msk [vmem:[#allocation4] sm:$0xff] %vm27_vm2, %v4624_v21 }
 0x1d3   :  { %2362 = vmatmul.mubr.msk.f32.gmra.mrb[90].mxu1 %vm1459_vm4, %v2797_v61 }
 0x1d4   :  { %2364 = vmatprep.mubr.msk.f32.mxu1 %vm1486_vm5, %v2797_v61 }
 0x1d7   :  { %2365 = vmatmul.mubr.msk.f32.gmra.mrb[92].mxu1 %vm1513_vm6, %v2797_v61  ;;  %v1878_v62 = vld [vmem:[#allocation4] sm:$0xff] }
 0x1d8   :  { %2367 = vmatprep.mubr.msk.f32.mxu1 %vm1540_vm7, %v2797_v61  ;;  %vm1880_vm3 = vcmp.gt.f32.partialorder %v1878_v62, 1.0  ;;  %v1883_v29 = vmul.f32 0.8, %v1878_v62 }
 0x1d9   :  { %v2006_v15 = vsel %vm1880_vm3, 1.0, %v4624_v21 }
 0x1db   :  { %2368 = vmatmul.mubr.msk.f32.gmra.mrb[94].mxu1 %vm1567_vm1, %v2797_v61 }
 0x272   :  { %v2262_v46 = vpop.f32.mrb[72].mxu1 }
 0x273   :  { %v2263_v1 = vpop.f32.mrb[73].mxu1 }
 0x274   :  { %v2264_v30 = vadd.f32 %v2263_v1, %v2262_v46 }
 0x276   :  { %v1726_v44 = vadd.f32 %v2264_v30, %v2005_v33 }
 0x27a   :  { %v2265_v35 = vpop.f32.mrb[74].mxu1 }
 0x27b   :  { %v2266_v57 = vpop.f32.mrb[75].mxu1 }
 0x27c   :  { %v2267_v48 = vadd.f32 %v2266_v57, %v2265_v35 }
 0x27e   :  { %v1731_v28 = vadd.f32 %v2267_v48, %v2005_v33 }
 0x280   :  { %v2268_v14 = vpop.f32.mrb[76].mxu1 }
 0x281   :  { %v2269_v52 = vpop.f32.mrb[77].mxu1 }
 0x282   :  { %v2270_v32 = vadd.f32 %v2269_v52, %v2268_v14 }
 0x284   :  { %v1736_v13 = vadd.f32 %v2270_v32, %v2005_v33 }
 0x286   :  { %v2271_v50 = vpop.f32.mrb[78].mxu1 }
 0x287   :  { %v2272_v17 = vpop.f32.mrb[79].mxu1 }
 0x288   :  { %v2273_v22 = vadd.f32 %v2272_v17, %v2271_v50 }
 0x28a   :  { %v1741_v25 = vadd.f32 %v2273_v22, %v2005_v33 }
 0x28c   :  { %v2274_v24 = vpop.f32.mrb[80].mxu1 }
 0x28d   :  { %v2275_v19 = vpop.f32.mrb[81].mxu1 }
 0x28e   :  { %v2276_v36 = vadd.f32 %v2275_v19, %v2274_v24 }
 0x290   :  { %v1746_v43 = vadd.f32 %v2276_v36, %v2005_v33 }
 0x292   :  { %v2277_v61 = vpop.f32.mrb[82].mxu1 }
 0x293   :  { %v2278_v31 = vpop.f32.mrb[83].mxu1 }
 0x294   :  { %v2279_v2 = vadd.f32 %v2278_v31, %v2277_v61 }
 0x296   :  { %v1751_v4 = vadd.f32 %v2279_v2, %v2005_v33 }
 0x298   :  { %v2280_v26 = vpop.f32.mrb[84].mxu1 }
 0x299   :  { %v2281_v12 = vpop.f32.mrb[85].mxu1 }
 0x29a   :  { %v2282_v45 = vadd.f32 %v2281_v12, %v2280_v26 }
 0x29c   :  { %v1756_v54 = vadd.f32 %v2282_v45, %v2005_v33 }
 0x29e   :  { %v2283_v18 = vpop.f32.mrb[86].mxu1 }
 0x29f   :  { %v2284_v27 = vpop.f32.mrb[87].mxu1 }
 0x2a0   :  { %v2285_v6 = vadd.f32 %v2284_v27, %v2283_v18 }
 0x2a2   :  { %v2360_v11 = vpop.f32.mrb[88].mxu1  ;;  %v1761_v23 = vadd.f32 %v2285_v6, %v2005_v33 }
 0x2a3   :  { %v1836_v7 = vadd.f32 %v2360_v11, %v1731_v28  ;;  %v1830_v9 = vpop.f32.mrb[89].mxu1 }
 0x2a4   :  { %v1831_v20 = vadd.f32 %v1830_v9, %v1726_v44 }
 0x2a5   :  { %1871 = vst.msk [vmem:[%s4611_s5 + $0x8] sm:$0xff] %vm27_vm2, %v1836_v7 }
 0x2a6   :  { %1870 = vst.msk [vmem:[%s4611_s5] sm:$0xff] %vm27_vm2, %v1831_v20  ;;  %v2363_v42 = vpop.f32.mrb[90].mxu1 }
 0x2a7   :  { %v1846_v55 = vadd.f32 %v2363_v42, %v1741_v25  ;;  %v1840_v16 = vpop.f32.mrb[91].mxu1 }
 0x2a8   :  { %v1841_v41 = vadd.f32 %v1840_v16, %v1736_v13 }
 0x2a9   :  { %1873 = vst.msk [vmem:[%s4611_s5 + $0x18] sm:$0xff] %vm27_vm2, %v1846_v55 }
 0x2aa   :  { %1872 = vst.msk [vmem:[%s4611_s5 + $0x10] sm:$0xff] %vm27_vm2, %v1841_v41  ;;  %v2366_v0 = vpop.f32.mrb[92].mxu1 }
 0x2ab   :  { %v1856_v5 = vadd.f32 %v2366_v0, %v1751_v4  ;;  %v1850_v60 = vpop.f32.mrb[93].mxu1 }
 0x2ac   :  { %v1851_v3 = vadd.f32 %v1850_v60, %v1746_v43  ;;  %v2007_v59 = vld [vmem:[%s4611_s5 + $0x8] sm:$0xff] }
 0x2ad   :  { %v1879_v63 = vld [vmem:[%s4611_s5] sm:$0xff]  ;;  %1875 = vst.msk [vmem:[%s4611_s5 + $0x28] sm:$0xff] %vm27_vm2, %v1856_v5 }
 0x2ae   :  { %v1884_v38 = vadd.f32 %v1883_v29, %v1879_v63  ;;  %1874 = vst.msk [vmem:[%s4611_s5 + $0x20] sm:$0xff] %vm27_vm2, %v1851_v3  ;;  %v2369_v40 = vpop.f32.mrb[94].mxu1 }
 0x2af   :  { %v1866_v56 = vadd.f32 %v2369_v40, %v1761_v23  ;;  %v1860_v39 = vpop.f32.mrb[95].mxu1 }
 0x2b0   :  { %v1885_v49 = vsub.f32 %v1884_v38, %v2006_v15  ;;  %v1861_v34 = vadd.f32 %v1860_v39, %v1756_v54  ;;  %v2013_v35 = vld [vmem:[%s4611_s5 + $0x18] sm:$0xff] }
 0x2b1   :  { %1877 = vst.msk [vmem:[%s4611_s5 + $0x38] sm:$0xff] %vm27_vm2, %v1866_v56  ;;  %v2010_v47 = vld [vmem:[%s4611_s5 + $0x10] sm:$0xff] }
 0x2b2   :  { %1886 = vst.msk [vmem:[%s4611_s5] sm:$0xff] %vm27_vm2, %v1885_v49  ;;  %vm1889_vm4 = vcmp.gt.f32.partialorder %v1885_v49, 1.0  ;;  %v1892_v53 = vmul.f32 0.8, %v1885_v49  ;;  %1876 = vst.msk [vmem:[%s4611_s5 + $0x30] sm:$0xff] %vm27_vm2, %v1861_v34 }
 0x2b3   :  { %v2008_v51 = vsel %vm1889_vm4, 1.0, %v4624_v21 }
 0x2b4   :  { %v1893_v8 = vadd.f32 %v2007_v59, %v1892_v53  ;;  %v2019_v19 = vld [vmem:[%s4611_s5 + $0x28] sm:$0xff] }
 0x2b5   :  { %v2016_v32 = vld [vmem:[%s4611_s5 + $0x20] sm:$0xff] }
 0x2b6   :  { %v1894_v58 = vsub.f32 %v1893_v8, %v2008_v51 }
 0x2b8   :  { %2009 = vst.msk [vmem:[%s4611_s5 + $0x8] sm:$0xff] %vm27_vm2, %v1894_v58  ;;  %vm1898_vm5 = vcmp.gt.f32.partialorder %v1894_v58, 1.0  ;;  %v1901_v10 = vmul.f32 0.8, %v1894_v58  ;;  %v2025_v33 = vld [vmem:[%s4611_s5 + $0x38] sm:$0xff] }
 0x2b9   :  { %v2011_v46 = vsel %vm1898_vm5, 1.0, %v4624_v21  ;;  %v2022_v26 = vld [vmem:[%s4611_s5 + $0x30] sm:$0xff] }
 0x2ba   :  { %v1902_v37 = vadd.f32 %v2010_v47, %v1901_v10 }
 0x2bc   :  { %v1903_v1 = vsub.f32 %v1902_v37, %v2011_v46 }
 0x2be   :  { %2012 = vst.msk [vmem:[%s4611_s5 + $0x10] sm:$0xff] %vm27_vm2, %v1903_v1  ;;  %vm1907_vm6 = vcmp.gt.f32.partialorder %v1903_v1, 1.0  ;;  %v1910_v30 = vmul.f32 0.8, %v1903_v1 }
 0x2bf   :  { %v2014_v48 = vsel %vm1907_vm6, 1.0, %v4624_v21 }
 0x2c0   :  { %v1911_v57 = vadd.f32 %v2013_v35, %v1910_v30 }
 0x2c2   :  { %v1912_v14 = vsub.f32 %v1911_v57, %v2014_v48 }
 0x2c4   :  { %2015 = vst.msk [vmem:[%s4611_s5 + $0x18] sm:$0xff] %vm27_vm2, %v1912_v14  ;;  %vm1916_vm7 = vcmp.gt.f32.partialorder %v1912_v14, 1.0  ;;  %v1919_v52 = vmul.f32 0.8, %v1912_v14 }
 0x2c5   :  { %v2017_v17 = vsel %vm1916_vm7, 1.0, %v4624_v21 }
 0x2c6   :  { %v1920_v50 = vadd.f32 %v2016_v32, %v1919_v52 }
 0x2c8   :  { %v1921_v22 = vsub.f32 %v1920_v50, %v2017_v17 }
 0x2ca   :  { %2018 = vst.msk [vmem:[%s4611_s5 + $0x20] sm:$0xff] %vm27_vm2, %v1921_v22  ;;  %vm1925_vm15 = vcmp.gt.f32.partialorder %v1921_v22, 1.0  ;;  %v1928_v24 = vmul.f32 0.8, %v1921_v22 }
 0x2cb   :  { %v2020_v61 = vsel %vm1925_vm15, 1.0, %v4624_v21 }
 0x2cc   :  { %v1929_v36 = vadd.f32 %v2019_v19, %v1928_v24 }
 0x2ce   :  { %v1930_v31 = vsub.f32 %v1929_v36, %v2020_v61 }
 0x2d0   :  { %2021 = vst.msk [vmem:[%s4611_s5 + $0x28] sm:$0xff] %vm27_vm2, %v1930_v31  ;;  %vm1934_vm0 = vcmp.gt.f32.partialorder %v1930_v31, 1.0  ;;  %v1937_v2 = vmul.f32 0.8, %v1930_v31 }
 0x2d1   :  { %v2023_v45 = vsel %vm1934_vm0, 1.0, %v4624_v21 }
 0x2d2   :  { %v1938_v12 = vadd.f32 %v2022_v26, %v1937_v2 }
 0x2d4   :  { %v1939_v18 = vsub.f32 %v1938_v12, %v2023_v45 }
 0x2d6   :  { %2024 = vst.msk [vmem:[%s4611_s5 + $0x30] sm:$0xff] %vm27_vm2, %v1939_v18  ;;  %vm1943_vm8 = vcmp.gt.f32.partialorder %v1939_v18, 1.0  ;;  %v1946_v27 = vmul.f32 0.8, %v1939_v18 }
 0x2d7   :  { %v2026_v28 = vsel %vm1943_vm8, 1.0, %v4624_v21 }
 0x2d8   :  { %v1947_v6 = vadd.f32 %v2025_v33, %v1946_v27 }
 0x2da   :  { %v1948_v11 = vsub.f32 %v1947_v6, %v2026_v28 }
 0x2dc   :  { %2027 = vst.msk [vmem:[%s4611_s5 + $0x38] sm:$0xff] %vm27_vm2, %v1948_v11  ;;  %1950 = vst.msk [vmem:[#allocation4] sm:$0xff] %vm27_vm2, %v1948_v11 }

</bundles_post_ra>
